<compile_context>
chip_gen: v7x
topology: tpu7x:2x2x1
jax: 0.10.0
libtpu: 0.0.40
codegen_flags: <defaults>
</compile_context>

<pallas_src>
import jax
import jax.numpy as jnp
from jax.experimental import pallas as pl
from jax.experimental.pallas import tpu as pltpu

BN_EPS = 1e-5


def _vertconv_kernel(x_ref, w_in1_ref, b_in1_ref, w_in2_ref,
                     w_red_ref, w_c1_ref, w_c2_ref, w_out_ref,
                     b_mid_ref, b_out_ref, o_ref, m_acc):
    ht = pl.program_id(1)
    n_ht = pl.num_programs(1)
    cin, w = m_acc.shape
    th = x_ref.shape[2]

    @pl.when(ht == 0)
    def _():
        m_acc[...] = jnp.full(m_acc.shape, -jnp.inf, dtype=m_acc.dtype)

    # ---- input_conv (1x1 -> sigmoid -> 1x1) on TH rows + running max over H.
    w1 = w_in1_ref[...]                       # x.dtype (bf16 MXU path if bf16 in)
    w2 = w_in2_ref[...]
    # Hoist the (Cin,1)->(Cin,W) bias broadcast once per grid step (no CSE of
    # broadcast_in_dim if left inside the unrolled loop).
    b1 = jnp.broadcast_to(b_in1_ref[...], (cin, w)).astype(jnp.float32)

    m = m_acc[...]
    for r in range(th):                       # static unroll; th bounded by wrapper
        xr = x_ref[0, :, r, :]                # (Cin, W) strided VMEM view
        a = jnp.dot(w1, xr, preferred_element_type=jnp.float32) + b1
        a = jax.nn.sigmoid(a)                 # f32 EUP path (v5e has no bf16 VPU/EUP)
        a = jnp.dot(w2, a.astype(w2.dtype), preferred_element_type=jnp.float32)
        m = jnp.maximum(m, a)                 # f32 running max
    m_acc[...] = m

    # ---- last H step: 1-D pipeline over W; write (Cout, W) once per batch. --
    @pl.when(ht == n_ht - 1)
    def _():
        bm = b_mid_ref[...]                   # (Cmid, 3) = [b_red | b_c1 | b_c2]
        mmax = m_acc[...]                     # (Cin, W), f32
        z0 = jnp.maximum(
            jnp.dot(w_red_ref[...], mmax, preferred_element_type=jnp.float32)
            + bm[:, 0:1], 0.0)                # (Cmid, W)

        def conv3_bn_relu(z, wcat, b_col):
            # k=3 "same" conv as ONE matmul: wcat is (Cmid, 3*Cmid) packed taps,
            # operand is [z_{j-1}; z_j; z_{j+1}] stacked to (3*Cmid, W).
            c, wd = z.shape
            zero = jnp.zeros((c, 1), dtype=z.dtype)
            z_m1 = jnp.concatenate([zero, z[:, :wd - 1]], axis=1)   # z[:, j-1]
            z_p1 = jnp.concatenate([z[:, 1:], zero], axis=1)        # z[:, j+1]
            zs = jnp.concatenate([z_m1, z, z_p1], axis=0)           # (3c, W)
            y = jnp.dot(wcat, zs, preferred_element_type=jnp.float32) + b_col
            return jnp.maximum(y, 0.0)

        z1 = conv3_bn_relu(z0, w_c1_ref[...], bm[:, 1:2])
        z2 = conv3_bn_relu(z1, w_c2_ref[...], bm[:, 2:3])
        z3 = z2 + z0
        out = jnp.maximum(
            jnp.dot(w_out_ref[...], z3, preferred_element_type=jnp.float32)
            + b_out_ref[...], 0.0)            # (Cout, W)
        o_ref[0, :, :] = out.astype(o_ref.dtype)


def _fold_bn(gamma, beta, mean, var, eps=BN_EPS):
    scale = gamma / jnp.sqrt(var + eps)
    shift = beta - mean * scale
    return scale, shift


def _pick_h_tile(H, Cin, W, itemsize):
    """Largest H-tile (rows per grid step) whose double-buffered x slab fits a
    conservative VMEM budget; must divide H and satisfy the (8,128) block rule
    (TH == H or TH % 8 == 0); capped to bound the statically unrolled loop."""
    budget = 8 << 20                          # fits v5e's 16 MiB scoped default
    row_bytes = max(1, Cin * W * itemsize)
    max_rows = min(max(1, budget // (2 * row_bytes)), 64, H)
    cands = [d for d in range(1, H + 1) if H % d == 0 and (d == H or d % 8 == 0)]
    fit = [d for d in cands if d <= max_rows]
    return max(fit) if fit else min(cands)


def vertconv_forward(x, params):
    """x: (B, Cin, H, W). Returns (B, Cout, W), same dtype as x."""
    B, Cin, H, W = x.shape
    Cmid = params["red_w"].shape[0]
    Cout = params["out_w"].shape[0]
    f32 = jnp.float32
    P = jax.lax.Precision.HIGHEST

    # ---- fold BN (inference) + conv biases into weights / per-ch shifts. ----
    w_in1 = params["in1_w"].astype(x.dtype)                    # heavy-loop dtype
    b_in1 = params["in1_b"].astype(f32)[:, None]
    w_in2 = params["in2_w"].astype(x.dtype)
    b_in2_col = params["in2_b"].astype(f32)[:, None]

    s_r, t_r = _fold_bn(*params["bn_red"])
    w_red = (s_r[:, None] * params["red_w"]).astype(f32)       # (Cmid, Cin)
    # b_in2 commutes with the max over H -> fold it through reduce_conv + BN.
    b_red = (jnp.dot(w_red, b_in2_col, precision=P) + t_r.astype(f32)[:, None])

    def pack_taps(w3, scale):                                  # (Cmid,Cmid,3) -> (Cmid,3*Cmid)
        wf = (scale[:, None, None] * w3).astype(f32)
        return jnp.concatenate([wf[:, :, 0], wf[:, :, 1], wf[:, :, 2]], axis=1)

    s1, t1 = _fold_bn(*params["bn1"])
    w_c1 = pack_taps(params["c1_w"], s1)
    b_c1 = t1.astype(f32)[:, None]

    s2, t2 = _fold_bn(*params["bn2"])
    w_c2 = pack_taps(params["c2_w"], s2)
    b_c2 = t2.astype(f32)[:, None]

    s_o, t_o = _fold_bn(*params["bn_out"])
    w_out = (s_o[:, None] * params["out_w"]).astype(f32)       # (Cout, Cmid)
    b_out = (s_o * params["out_b"] + t_o).astype(f32)[:, None]

    b_mid = jnp.concatenate([b_red, b_c1, b_c2], axis=1).astype(f32)   # (Cmid, 3)

    # ---- tiling: TH rows of the native (B,Cin,H,W) layout per grid step. ----
    TH = _pick_h_tile(H, Cin, W, jnp.dtype(x.dtype).itemsize)
    grid = (B, H // TH)
    const2 = lambda b, h: (0, 0)

    out = pl.pallas_call(
        _vertconv_kernel,
        out_shape=jax.ShapeDtypeStruct((B, Cout, W), x.dtype),
        grid_spec=pltpu.PrefetchScalarGridSpec(
            num_scalar_prefetch=0,
            grid=grid,
            in_specs=[
                pl.BlockSpec((1, Cin, TH, W), lambda b, h: (b, 0, h, 0)),  # x slab
                pl.BlockSpec((Cin, Cin), const2),        # w_in1
                pl.BlockSpec((Cin, 1), const2),          # b_in1
                pl.BlockSpec((Cin, Cin), const2),        # w_in2 (b folded away)
                pl.BlockSpec((Cmid, Cin), const2),       # w_red (BN folded)
                pl.BlockSpec((Cmid, 3 * Cmid), const2),  # conv1 packed taps
                pl.BlockSpec((Cmid, 3 * Cmid), const2),  # conv2 packed taps
                pl.BlockSpec((Cout, Cmid), const2),      # w_out (BN folded)
                pl.BlockSpec((Cmid, 3), const2),         # packed BN shifts
                pl.BlockSpec((Cout, 1), const2),         # b_out
            ],
            out_specs=pl.BlockSpec((1, Cout, W), lambda b, h: (b, 0, 0)),
            scratch_shapes=[pltpu.VMEM((Cin, W), jnp.float32)],
        ),
        compiler_params=pltpu.CompilerParams(
            dimension_semantics=("parallel", "arbitrary")),
    )(x, w_in1, b_in1, w_in2, w_red, w_c1, w_c2, w_out, b_mid, b_out)
    return out


def vertconv_reference(x, params):
    """Pure-JAX reference matching the PyTorch forward (inference BN)."""
    P = jax.lax.Precision.HIGHEST
    a = (jnp.einsum("oc,bchw->bohw", params["in1_w"], x, precision=P)
         + params["in1_b"][None, :, None, None])
    a = jax.nn.sigmoid(a)
    a = (jnp.einsum("oc,bchw->bohw", params["in2_w"], a, precision=P)
         + params["in2_b"][None, :, None, None])
    m = a.max(axis=2)                                             # (B, Cin, W)

    def bn(z, stats):
        g, b, mu, var = stats
        return (g[None, :, None] * (z - mu[None, :, None])
                / jnp.sqrt(var[None, :, None] + BN_EPS) + b[None, :, None])

    def conv1(z, w):
        return jnp.einsum("oc,bcw->bow", w, z, precision=P)

    def conv3(z, w):
        zp = jnp.pad(z, ((0, 0), (0, 0), (1, 1)))
        return (jnp.einsum("oc,bcw->bow", w[:, :, 0], zp[:, :, :-2], precision=P)
                + jnp.einsum("oc,bcw->bow", w[:, :, 1], zp[:, :, 1:-1], precision=P)
                + jnp.einsum("oc,bcw->bow", w[:, :, 2], zp[:, :, 2:], precision=P))

    z0 = jax.nn.relu(bn(conv1(m, params["red_w"]), params["bn_red"]))
    z1 = jax.nn.relu(bn(conv3(z0, params["c1_w"]), params["bn1"]))
    z2 = jax.nn.relu(bn(conv3(z1, params["c2_w"]), params["bn2"]))
    z3 = z2 + z0
    y = conv1(z3, params["out_w"]) + params["out_b"][None, :, None]
    return jax.nn.relu(bn(y, params["bn_out"]))


if __name__ == "__main__":
    key = jax.random.PRNGKey(0)
    B, Cin, Cmid, Cout, H, W = 2, 4, 8, 4, 16, 16
    keys = jax.random.split(key, 16)

    def u(k, shape, bound):
        return jax.random.uniform(k, shape, jnp.float32, -bound, bound)

    def bn_stats(k, c):
        k1, k2, k3, k4 = jax.random.split(k, 4)
        gamma = jax.random.uniform(k1, (c,), jnp.float32, 0.5, 1.5)
        beta = 0.1 * jax.random.normal(k2, (c,), jnp.float32)
        mean = 0.1 * jax.random.normal(k3, (c,), jnp.float32)
        var = jax.random.uniform(k4, (c,), jnp.float32, 0.5, 1.5)
        return (gamma, beta, mean, var)

    params = {
        "in1_w": u(keys[0], (Cin, Cin), 1.0 / (Cin ** 0.5)),
        "in1_b": u(keys[1], (Cin,), 1.0 / (Cin ** 0.5)),
        "in2_w": u(keys[2], (Cin, Cin), 1.0 / (Cin ** 0.5)),
        "in2_b": u(keys[3], (Cin,), 1.0 / (Cin ** 0.5)),
        "red_w": u(keys[4], (Cmid, Cin), 1.0 / (Cin ** 0.5)),
        "bn_red": bn_stats(keys[5], Cmid),
        "c1_w": u(keys[6], (Cmid, Cmid, 3), 1.0 / ((Cmid * 3) ** 0.5)),
        "bn1": bn_stats(keys[7], Cmid),
        "c2_w": u(keys[8], (Cmid, Cmid, 3), 1.0 / ((Cmid * 3) ** 0.5)),
        "bn2": bn_stats(keys[9], Cmid),
        "out_w": u(keys[10], (Cout, Cmid), 1.0 / (Cmid ** 0.5)),
        "out_b": u(keys[11], (Cout,), 1.0 / (Cmid ** 0.5)),
        "bn_out": bn_stats(keys[12], Cout),
    }

    x = jax.random.normal(keys[13], (B, Cin, H, W), dtype=jnp.float32)

    out = vertconv_forward(x, params)
    out = jax.block_until_ready(out)
    ref = vertconv_reference(x, params)

    assert out.shape == (B, Cout, W) and out.dtype == x.dtype
    err = float(jnp.max(jnp.abs(out - ref)))
    assert jnp.allclose(out, ref, atol=2e-3, rtol=2e-3), f"mismatch vs reference, max abs err={err}"
    print("KERNEL_OK")
</pallas_src>

<mosaic_0001>
module attributes {stable_mosaic.version = 11 : i64} {
  func.func @_vertconv_kernel(%arg0: i32, %arg1: i32, %arg2: memref<1x4x16x16xf32, #tpu.memory_space<vmem>>, %arg3: memref<4x4xf32, #tpu.memory_space<vmem>>, %arg4: memref<4x1xf32, #tpu.memory_space<vmem>>, %arg5: memref<4x4xf32, #tpu.memory_space<vmem>>, %arg6: memref<8x4xf32, #tpu.memory_space<vmem>>, %arg7: memref<8x24xf32, #tpu.memory_space<vmem>>, %arg8: memref<8x24xf32, #tpu.memory_space<vmem>>, %arg9: memref<4x8xf32, #tpu.memory_space<vmem>>, %arg10: memref<8x3xf32, #tpu.memory_space<vmem>>, %arg11: memref<4x1xf32, #tpu.memory_space<vmem>>, %arg12: memref<1x4x16xf32, #tpu.memory_space<vmem>>, %arg13: memref<4x16xf32, #tpu.memory_space<vmem>>) attributes {dimension_semantics = [#tpu.dimension_semantics<parallel>, #tpu.dimension_semantics<arbitrary>], iteration_bounds = array<i64: 2, 1>, scalar_prefetch = 0 : i64, scratch_operands = 1 : i64, tpu.core_type = #tpu.core_type<tc>, window_params = [{transform_indices = @transform_0, window_bounds = array<i64: 1, 4, 16, 16>}, {pipeline_mode = #tpu.pipeline_mode<synchronous>, transform_indices = @transform_1, window_bounds = array<i64: 4, 4>}, {pipeline_mode = #tpu.pipeline_mode<synchronous>, transform_indices = @transform_2, window_bounds = array<i64: 4, 1>}, {pipeline_mode = #tpu.pipeline_mode<synchronous>, transform_indices = @transform_3, window_bounds = array<i64: 4, 4>}, {pipeline_mode = #tpu.pipeline_mode<synchronous>, transform_indices = @transform_4, window_bounds = array<i64: 8, 4>}, {pipeline_mode = #tpu.pipeline_mode<synchronous>, transform_indices = @transform_5, window_bounds = array<i64: 8, 24>}, {pipeline_mode = #tpu.pipeline_mode<synchronous>, transform_indices = @transform_6, window_bounds = array<i64: 8, 24>}, {pipeline_mode = #tpu.pipeline_mode<synchronous>, transform_indices = @transform_7, window_bounds = array<i64: 4, 8>}, {pipeline_mode = #tpu.pipeline_mode<synchronous>, transform_indices = @transform_8, window_bounds = array<i64: 8, 3>}, {pipeline_mode = #tpu.pipeline_mode<synchronous>, transform_indices = @transform_9, window_bounds = array<i64: 4, 1>}, {transform_indices = @transform_10, window_bounds = array<i64: 1, 4, 16>}]} {
    %c0_i32 = arith.constant 0 : i32
    %0 = arith.cmpi eq, %arg1, %c0_i32 : i32
    %1 = arith.extui %0 : i1 to i32
    %c0_i32_0 = arith.constant 0 : i32
    %2 = arith.cmpi ne, %1, %c0_i32_0 : i32
    scf.if %2 {
      %cst_108 = arith.constant 0xFF800000 : f32
      %189 = vector.broadcast %cst_108 : f32 to vector<4x16xf32>
      %c0_109 = arith.constant 0 : index
      %c0_110 = arith.constant 0 : index
      %190 = vector.load %arg13[%c0_109, %c0_110] : memref<4x16xf32, #tpu.memory_space<vmem>>, vector<4x16xf32>
      tpu.vector_store %arg13[%c0_109, %c0_110], %189 {strides = array<i32>} : memref<4x16xf32, #tpu.memory_space<vmem>>, vector<4x16xf32>,
    } else {
    }
    %c0 = arith.constant 0 : index
    %c0_1 = arith.constant 0 : index
    %3 = vector.load %arg3[%c0, %c0_1] : memref<4x4xf32, #tpu.memory_space<vmem>>, vector<4x4xf32>
    %c0_2 = arith.constant 0 : index
    %c0_3 = arith.constant 0 : index
    %4 = vector.load %arg5[%c0_2, %c0_3] : memref<4x4xf32, #tpu.memory_space<vmem>>, vector<4x4xf32>
    %c0_4 = arith.constant 0 : index
    %c0_5 = arith.constant 0 : index
    %5 = vector.load %arg4[%c0_4, %c0_5] : memref<4x1xf32, #tpu.memory_space<vmem>>, vector<4x1xf32>
    %6 = vector.shape_cast %5 : vector<4x1xf32> to vector<4x1xf32>
    %7 = vector.broadcast %6 : vector<4x1xf32> to vector<4x16xf32>
    %c0_6 = arith.constant 0 : index
    %c0_7 = arith.constant 0 : index
    %8 = vector.load %arg13[%c0_6, %c0_7] : memref<4x16xf32, #tpu.memory_space<vmem>>, vector<4x16xf32>
    %c0_8 = arith.constant 0 : index
    %c0_9 = arith.constant 0 : index
    %c0_10 = arith.constant 0 : index
    %c0_11 = arith.constant 0 : index
    %9 = vector.load %arg2[%c0_8, %c0_9, %c0_10, %c0_11] : memref<1x4x16x16xf32, #tpu.memory_space<vmem>>, vector<1x4x1x16xf32>
    %10 = vector.shape_cast %9 : vector<1x4x1x16xf32> to vector<4x16xf32>
    %cst = arith.constant dense<0.000000e+00> : vector<4x16xf32>
    %11 = tpu.matmul %3, %10, %cst {dimension_numbers = #tpu.dot_dimension_numbers<[1], [0], [0], [1], [0, 0, 1, 1], [], []>} : vector<4x4xf32>, vector<4x16xf32>, vector<4x16xf32> -> vector<4x16xf32>
    %12 = arith.addf %11, %7 : vector<4x16xf32>
    %13 = arith.negf %12 : vector<4x16xf32>
    %14 = math.exp %13 : vector<4x16xf32>
    %cst_12 = arith.constant 1.000000e+00 : f32
    %15 = vector.broadcast %cst_12 : f32 to vector<4x16xf32>
    %16 = arith.addf %15, %14 : vector<4x16xf32>
    %17 = arith.divf %15, %16 : vector<4x16xf32>
    %cst_13 = arith.constant dense<0.000000e+00> : vector<4x16xf32>
    %18 = tpu.matmul %4, %17, %cst_13 {dimension_numbers = #tpu.dot_dimension_numbers<[1], [0], [0], [1], [0, 0, 1, 1], [], []>} : vector<4x4xf32>, vector<4x16xf32>, vector<4x16xf32> -> vector<4x16xf32>
    %19 = arith.maximumf %8, %18 : vector<4x16xf32>
    %c0_14 = arith.constant 0 : index
    %c0_15 = arith.constant 0 : index
    %c1 = arith.constant 1 : index
    %c0_16 = arith.constant 0 : index
    %20 = vector.load %arg2[%c0_14, %c0_15, %c1, %c0_16] : memref<1x4x16x16xf32, #tpu.memory_space<vmem>>, vector<1x4x1x16xf32>
    %21 = vector.shape_cast %20 : vector<1x4x1x16xf32> to vector<4x16xf32>
    %cst_17 = arith.constant dense<0.000000e+00> : vector<4x16xf32>
    %22 = tpu.matmul %3, %21, %cst_17 {dimension_numbers = #tpu.dot_dimension_numbers<[1], [0], [0], [1], [0, 0, 1, 1], [], []>} : vector<4x4xf32>, vector<4x16xf32>, vector<4x16xf32> -> vector<4x16xf32>
    %23 = arith.addf %22, %7 : vector<4x16xf32>
    %24 = arith.negf %23 : vector<4x16xf32>
    %25 = math.exp %24 : vector<4x16xf32>
    %cst_18 = arith.constant 1.000000e+00 : f32
    %26 = vector.broadcast %cst_18 : f32 to vector<4x16xf32>
    %27 = arith.addf %26, %25 : vector<4x16xf32>
    %28 = arith.divf %26, %27 : vector<4x16xf32>
    %cst_19 = arith.constant dense<0.000000e+00> : vector<4x16xf32>
    %29 = tpu.matmul %4, %28, %cst_19 {dimension_numbers = #tpu.dot_dimension_numbers<[1], [0], [0], [1], [0, 0, 1, 1], [], []>} : vector<4x4xf32>, vector<4x16xf32>, vector<4x16xf32> -> vector<4x16xf32>
    %30 = arith.maximumf %19, %29 : vector<4x16xf32>
    %c0_20 = arith.constant 0 : index
    %c0_21 = arith.constant 0 : index
    %c2 = arith.constant 2 : index
    %c0_22 = arith.constant 0 : index
    %31 = vector.load %arg2[%c0_20, %c0_21, %c2, %c0_22] : memref<1x4x16x16xf32, #tpu.memory_space<vmem>>, vector<1x4x1x16xf32>
    %32 = vector.shape_cast %31 : vector<1x4x1x16xf32> to vector<4x16xf32>
    %cst_23 = arith.constant dense<0.000000e+00> : vector<4x16xf32>
    %33 = tpu.matmul %3, %32, %cst_23 {dimension_numbers = #tpu.dot_dimension_numbers<[1], [0], [0], [1], [0, 0, 1, 1], [], []>} : vector<4x4xf32>, vector<4x16xf32>, vector<4x16xf32> -> vector<4x16xf32>
    %34 = arith.addf %33, %7 : vector<4x16xf32>
    %35 = arith.negf %34 : vector<4x16xf32>
    %36 = math.exp %35 : vector<4x16xf32>
    %cst_24 = arith.constant 1.000000e+00 : f32
    %37 = vector.broadcast %cst_24 : f32 to vector<4x16xf32>
    %38 = arith.addf %37, %36 : vector<4x16xf32>
    %39 = arith.divf %37, %38 : vector<4x16xf32>
    %cst_25 = arith.constant dense<0.000000e+00> : vector<4x16xf32>
    %40 = tpu.matmul %4, %39, %cst_25 {dimension_numbers = #tpu.dot_dimension_numbers<[1], [0], [0], [1], [0, 0, 1, 1], [], []>} : vector<4x4xf32>, vector<4x16xf32>, vector<4x16xf32> -> vector<4x16xf32>
    %41 = arith.maximumf %30, %40 : vector<4x16xf32>
    %c0_26 = arith.constant 0 : index
    %c0_27 = arith.constant 0 : index
    %c3 = arith.constant 3 : index
    %c0_28 = arith.constant 0 : index
    %42 = vector.load %arg2[%c0_26, %c0_27, %c3, %c0_28] : memref<1x4x16x16xf32, #tpu.memory_space<vmem>>, vector<1x4x1x16xf32>
    %43 = vector.shape_cast %42 : vector<1x4x1x16xf32> to vector<4x16xf32>
    %cst_29 = arith.constant dense<0.000000e+00> : vector<4x16xf32>
    %44 = tpu.matmul %3, %43, %cst_29 {dimension_numbers = #tpu.dot_dimension_numbers<[1], [0], [0], [1], [0, 0, 1, 1], [], []>} : vector<4x4xf32>, vector<4x16xf32>, vector<4x16xf32> -> vector<4x16xf32>
    %45 = arith.addf %44, %7 : vector<4x16xf32>
    %46 = arith.negf %45 : vector<4x16xf32>
    %47 = math.exp %46 : vector<4x16xf32>
    %cst_30 = arith.constant 1.000000e+00 : f32
    %48 = vector.broadcast %cst_30 : f32 to vector<4x16xf32>
    %49 = arith.addf %48, %47 : vector<4x16xf32>
    %50 = arith.divf %48, %49 : vector<4x16xf32>
    %cst_31 = arith.constant dense<0.000000e+00> : vector<4x16xf32>
    %51 = tpu.matmul %4, %50, %cst_31 {dimension_numbers = #tpu.dot_dimension_numbers<[1], [0], [0], [1], [0, 0, 1, 1], [], []>} : vector<4x4xf32>, vector<4x16xf32>, vector<4x16xf32> -> vector<4x16xf32>
    %52 = arith.maximumf %41, %51 : vector<4x16xf32>
    %c0_32 = arith.constant 0 : index
    %c0_33 = arith.constant 0 : index
    %c4 = arith.constant 4 : index
    %c0_34 = arith.constant 0 : index
    %53 = vector.load %arg2[%c0_32, %c0_33, %c4, %c0_34] : memref<1x4x16x16xf32, #tpu.memory_space<vmem>>, vector<1x4x1x16xf32>
    %54 = vector.shape_cast %53 : vector<1x4x1x16xf32> to vector<4x16xf32>
    %cst_35 = arith.constant dense<0.000000e+00> : vector<4x16xf32>
    %55 = tpu.matmul %3, %54, %cst_35 {dimension_numbers = #tpu.dot_dimension_numbers<[1], [0], [0], [1], [0, 0, 1, 1], [], []>} : vector<4x4xf32>, vector<4x16xf32>, vector<4x16xf32> -> vector<4x16xf32>
    %56 = arith.addf %55, %7 : vector<4x16xf32>
    %57 = arith.negf %56 : vector<4x16xf32>
    %58 = math.exp %57 : vector<4x16xf32>
    %cst_36 = arith.constant 1.000000e+00 : f32
    %59 = vector.broadcast %cst_36 : f32 to vector<4x16xf32>
    %60 = arith.addf %59, %58 : vector<4x16xf32>
    %61 = arith.divf %59, %60 : vector<4x16xf32>
    %cst_37 = arith.constant dense<0.000000e+00> : vector<4x16xf32>
    %62 = tpu.matmul %4, %61, %cst_37 {dimension_numbers = #tpu.dot_dimension_numbers<[1], [0], [0], [1], [0, 0, 1, 1], [], []>} : vector<4x4xf32>, vector<4x16xf32>, vector<4x16xf32> -> vector<4x16xf32>
    %63 = arith.maximumf %52, %62 : vector<4x16xf32>
    %c0_38 = arith.constant 0 : index
    %c0_39 = arith.constant 0 : index
    %c5 = arith.constant 5 : index
    %c0_40 = arith.constant 0 : index
    %64 = vector.load %arg2[%c0_38, %c0_39, %c5, %c0_40] : memref<1x4x16x16xf32, #tpu.memory_space<vmem>>, vector<1x4x1x16xf32>
    %65 = vector.shape_cast %64 : vector<1x4x1x16xf32> to vector<4x16xf32>
    %cst_41 = arith.constant dense<0.000000e+00> : vector<4x16xf32>
    %66 = tpu.matmul %3, %65, %cst_41 {dimension_numbers = #tpu.dot_dimension_numbers<[1], [0], [0], [1], [0, 0, 1, 1], [], []>} : vector<4x4xf32>, vector<4x16xf32>, vector<4x16xf32> -> vector<4x16xf32>
    %67 = arith.addf %66, %7 : vector<4x16xf32>
    %68 = arith.negf %67 : vector<4x16xf32>
    %69 = math.exp %68 : vector<4x16xf32>
    %cst_42 = arith.constant 1.000000e+00 : f32
    %70 = vector.broadcast %cst_42 : f32 to vector<4x16xf32>
    %71 = arith.addf %70, %69 : vector<4x16xf32>
    %72 = arith.divf %70, %71 : vector<4x16xf32>
    %cst_43 = arith.constant dense<0.000000e+00> : vector<4x16xf32>
    %73 = tpu.matmul %4, %72, %cst_43 {dimension_numbers = #tpu.dot_dimension_numbers<[1], [0], [0], [1], [0, 0, 1, 1], [], []>} : vector<4x4xf32>, vector<4x16xf32>, vector<4x16xf32> -> vector<4x16xf32>
    %74 = arith.maximumf %63, %73 : vector<4x16xf32>
    %c0_44 = arith.constant 0 : index
    %c0_45 = arith.constant 0 : index
    %c6 = arith.constant 6 : index
    %c0_46 = arith.constant 0 : index
    %75 = vector.load %arg2[%c0_44, %c0_45, %c6, %c0_46] : memref<1x4x16x16xf32, #tpu.memory_space<vmem>>, vector<1x4x1x16xf32>
    %76 = vector.shape_cast %75 : vector<1x4x1x16xf32> to vector<4x16xf32>
    %cst_47 = arith.constant dense<0.000000e+00> : vector<4x16xf32>
    %77 = tpu.matmul %3, %76, %cst_47 {dimension_numbers = #tpu.dot_dimension_numbers<[1], [0], [0], [1], [0, 0, 1, 1], [], []>} : vector<4x4xf32>, vector<4x16xf32>, vector<4x16xf32> -> vector<4x16xf32>
    %78 = arith.addf %77, %7 : vector<4x16xf32>
    %79 = arith.negf %78 : vector<4x16xf32>
    %80 = math.exp %79 : vector<4x16xf32>
    %cst_48 = arith.constant 1.000000e+00 : f32
    %81 = vector.broadcast %cst_48 : f32 to vector<4x16xf32>
    %82 = arith.addf %81, %80 : vector<4x16xf32>
    %83 = arith.divf %81, %82 : vector<4x16xf32>
    %cst_49 = arith.constant dense<0.000000e+00> : vector<4x16xf32>
    %84 = tpu.matmul %4, %83, %cst_49 {dimension_numbers = #tpu.dot_dimension_numbers<[1], [0], [0], [1], [0, 0, 1, 1], [], []>} : vector<4x4xf32>, vector<4x16xf32>, vector<4x16xf32> -> vector<4x16xf32>
    %85 = arith.maximumf %74, %84 : vector<4x16xf32>
    %c0_50 = arith.constant 0 : index
    %c0_51 = arith.constant 0 : index
    %c7 = arith.constant 7 : index
    %c0_52 = arith.constant 0 : index
    %86 = vector.load %arg2[%c0_50, %c0_51, %c7, %c0_52] : memref<1x4x16x16xf32, #tpu.memory_space<vmem>>, vector<1x4x1x16xf32>
    %87 = vector.shape_cast %86 : vector<1x4x1x16xf32> to vector<4x16xf32>
    %cst_53 = arith.constant dense<0.000000e+00> : vector<4x16xf32>
    %88 = tpu.matmul %3, %87, %cst_53 {dimension_numbers = #tpu.dot_dimension_numbers<[1], [0], [0], [1], [0, 0, 1, 1], [], []>} : vector<4x4xf32>, vector<4x16xf32>, vector<4x16xf32> -> vector<4x16xf32>
    %89 = arith.addf %88, %7 : vector<4x16xf32>
    %90 = arith.negf %89 : vector<4x16xf32>
    %91 = math.exp %90 : vector<4x16xf32>
    %cst_54 = arith.constant 1.000000e+00 : f32
    %92 = vector.broadcast %cst_54 : f32 to vector<4x16xf32>
    %93 = arith.addf %92, %91 : vector<4x16xf32>
    %94 = arith.divf %92, %93 : vector<4x16xf32>
    %cst_55 = arith.constant dense<0.000000e+00> : vector<4x16xf32>
    %95 = tpu.matmul %4, %94, %cst_55 {dimension_numbers = #tpu.dot_dimension_numbers<[1], [0], [0], [1], [0, 0, 1, 1], [], []>} : vector<4x4xf32>, vector<4x16xf32>, vector<4x16xf32> -> vector<4x16xf32>
    %96 = arith.maximumf %85, %95 : vector<4x16xf32>
    %c0_56 = arith.constant 0 : index
    %c0_57 = arith.constant 0 : index
    %c8 = arith.constant 8 : index
    %c0_58 = arith.constant 0 : index
    %97 = vector.load %arg2[%c0_56, %c0_57, %c8, %c0_58] : memref<1x4x16x16xf32, #tpu.memory_space<vmem>>, vector<1x4x1x16xf32>
    %98 = vector.shape_cast %97 : vector<1x4x1x16xf32> to vector<4x16xf32>
    %cst_59 = arith.constant dense<0.000000e+00> : vector<4x16xf32>
    %99 = tpu.matmul %3, %98, %cst_59 {dimension_numbers = #tpu.dot_dimension_numbers<[1], [0], [0], [1], [0, 0, 1, 1], [], []>} : vector<4x4xf32>, vector<4x16xf32>, vector<4x16xf32> -> vector<4x16xf32>
    %100 = arith.addf %99, %7 : vector<4x16xf32>
    %101 = arith.negf %100 : vector<4x16xf32>
    %102 = math.exp %101 : vector<4x16xf32>
    %cst_60 = arith.constant 1.000000e+00 : f32
    %103 = vector.broadcast %cst_60 : f32 to vector<4x16xf32>
    %104 = arith.addf %103, %102 : vector<4x16xf32>
    %105 = arith.divf %103, %104 : vector<4x16xf32>
    %cst_61 = arith.constant dense<0.000000e+00> : vector<4x16xf32>
    %106 = tpu.matmul %4, %105, %cst_61 {dimension_numbers = #tpu.dot_dimension_numbers<[1], [0], [0], [1], [0, 0, 1, 1], [], []>} : vector<4x4xf32>, vector<4x16xf32>, vector<4x16xf32> -> vector<4x16xf32>
    %107 = arith.maximumf %96, %106 : vector<4x16xf32>
    %c0_62 = arith.constant 0 : index
    %c0_63 = arith.constant 0 : index
    %c9 = arith.constant 9 : index
    %c0_64 = arith.constant 0 : index
    %108 = vector.load %arg2[%c0_62, %c0_63, %c9, %c0_64] : memref<1x4x16x16xf32, #tpu.memory_space<vmem>>, vector<1x4x1x16xf32>
    %109 = vector.shape_cast %108 : vector<1x4x1x16xf32> to vector<4x16xf32>
    %cst_65 = arith.constant dense<0.000000e+00> : vector<4x16xf32>
    %110 = tpu.matmul %3, %109, %cst_65 {dimension_numbers = #tpu.dot_dimension_numbers<[1], [0], [0], [1], [0, 0, 1, 1], [], []>} : vector<4x4xf32>, vector<4x16xf32>, vector<4x16xf32> -> vector<4x16xf32>
    %111 = arith.addf %110, %7 : vector<4x16xf32>
    %112 = arith.negf %111 : vector<4x16xf32>
    %113 = math.exp %112 : vector<4x16xf32>
    %cst_66 = arith.constant 1.000000e+00 : f32
    %114 = vector.broadcast %cst_66 : f32 to vector<4x16xf32>
    %115 = arith.addf %114, %113 : vector<4x16xf32>
    %116 = arith.divf %114, %115 : vector<4x16xf32>
    %cst_67 = arith.constant dense<0.000000e+00> : vector<4x16xf32>
    %117 = tpu.matmul %4, %116, %cst_67 {dimension_numbers = #tpu.dot_dimension_numbers<[1], [0], [0], [1], [0, 0, 1, 1], [], []>} : vector<4x4xf32>, vector<4x16xf32>, vector<4x16xf32> -> vector<4x16xf32>
    %118 = arith.maximumf %107, %117 : vector<4x16xf32>
    %c0_68 = arith.constant 0 : index
    %c0_69 = arith.constant 0 : index
    %c10 = arith.constant 10 : index
    %c0_70 = arith.constant 0 : index
    %119 = vector.load %arg2[%c0_68, %c0_69, %c10, %c0_70] : memref<1x4x16x16xf32, #tpu.memory_space<vmem>>, vector<1x4x1x16xf32>
    %120 = vector.shape_cast %119 : vector<1x4x1x16xf32> to vector<4x16xf32>
    %cst_71 = arith.constant dense<0.000000e+00> : vector<4x16xf32>
    %121 = tpu.matmul %3, %120, %cst_71 {dimension_numbers = #tpu.dot_dimension_numbers<[1], [0], [0], [1], [0, 0, 1, 1], [], []>} : vector<4x4xf32>, vector<4x16xf32>, vector<4x16xf32> -> vector<4x16xf32>
    %122 = arith.addf %121, %7 : vector<4x16xf32>
    %123 = arith.negf %122 : vector<4x16xf32>
    %124 = math.exp %123 : vector<4x16xf32>
    %cst_72 = arith.constant 1.000000e+00 : f32
    %125 = vector.broadcast %cst_72 : f32 to vector<4x16xf32>
    %126 = arith.addf %125, %124 : vector<4x16xf32>
    %127 = arith.divf %125, %126 : vector<4x16xf32>
    %cst_73 = arith.constant dense<0.000000e+00> : vector<4x16xf32>
    %128 = tpu.matmul %4, %127, %cst_73 {dimension_numbers = #tpu.dot_dimension_numbers<[1], [0], [0], [1], [0, 0, 1, 1], [], []>} : vector<4x4xf32>, vector<4x16xf32>, vector<4x16xf32> -> vector<4x16xf32>
    %129 = arith.maximumf %118, %128 : vector<4x16xf32>
    %c0_74 = arith.constant 0 : index
    %c0_75 = arith.constant 0 : index
    %c11 = arith.constant 11 : index
    %c0_76 = arith.constant 0 : index
    %130 = vector.load %arg2[%c0_74, %c0_75, %c11, %c0_76] : memref<1x4x16x16xf32, #tpu.memory_space<vmem>>, vector<1x4x1x16xf32>
    %131 = vector.shape_cast %130 : vector<1x4x1x16xf32> to vector<4x16xf32>
    %cst_77 = arith.constant dense<0.000000e+00> : vector<4x16xf32>
    %132 = tpu.matmul %3, %131, %cst_77 {dimension_numbers = #tpu.dot_dimension_numbers<[1], [0], [0], [1], [0, 0, 1, 1], [], []>} : vector<4x4xf32>, vector<4x16xf32>, vector<4x16xf32> -> vector<4x16xf32>
    %133 = arith.addf %132, %7 : vector<4x16xf32>
    %134 = arith.negf %133 : vector<4x16xf32>
    %135 = math.exp %134 : vector<4x16xf32>
    %cst_78 = arith.constant 1.000000e+00 : f32
    %136 = vector.broadcast %cst_78 : f32 to vector<4x16xf32>
    %137 = arith.addf %136, %135 : vector<4x16xf32>
    %138 = arith.divf %136, %137 : vector<4x16xf32>
    %cst_79 = arith.constant dense<0.000000e+00> : vector<4x16xf32>
    %139 = tpu.matmul %4, %138, %cst_79 {dimension_numbers = #tpu.dot_dimension_numbers<[1], [0], [0], [1], [0, 0, 1, 1], [], []>} : vector<4x4xf32>, vector<4x16xf32>, vector<4x16xf32> -> vector<4x16xf32>
    %140 = arith.maximumf %129, %139 : vector<4x16xf32>
    %c0_80 = arith.constant 0 : index
    %c0_81 = arith.constant 0 : index
    %c12 = arith.constant 12 : index
    %c0_82 = arith.constant 0 : index
    %141 = vector.load %arg2[%c0_80, %c0_81, %c12, %c0_82] : memref<1x4x16x16xf32, #tpu.memory_space<vmem>>, vector<1x4x1x16xf32>
    %142 = vector.shape_cast %141 : vector<1x4x1x16xf32> to vector<4x16xf32>
    %cst_83 = arith.constant dense<0.000000e+00> : vector<4x16xf32>
    %143 = tpu.matmul %3, %142, %cst_83 {dimension_numbers = #tpu.dot_dimension_numbers<[1], [0], [0], [1], [0, 0, 1, 1], [], []>} : vector<4x4xf32>, vector<4x16xf32>, vector<4x16xf32> -> vector<4x16xf32>
    %144 = arith.addf %143, %7 : vector<4x16xf32>
    %145 = arith.negf %144 : vector<4x16xf32>
    %146 = math.exp %145 : vector<4x16xf32>
    %cst_84 = arith.constant 1.000000e+00 : f32
    %147 = vector.broadcast %cst_84 : f32 to vector<4x16xf32>
    %148 = arith.addf %147, %146 : vector<4x16xf32>
    %149 = arith.divf %147, %148 : vector<4x16xf32>
    %cst_85 = arith.constant dense<0.000000e+00> : vector<4x16xf32>
    %150 = tpu.matmul %4, %149, %cst_85 {dimension_numbers = #tpu.dot_dimension_numbers<[1], [0], [0], [1], [0, 0, 1, 1], [], []>} : vector<4x4xf32>, vector<4x16xf32>, vector<4x16xf32> -> vector<4x16xf32>
    %151 = arith.maximumf %140, %150 : vector<4x16xf32>
    %c0_86 = arith.constant 0 : index
    %c0_87 = arith.constant 0 : index
    %c13 = arith.constant 13 : index
    %c0_88 = arith.constant 0 : index
    %152 = vector.load %arg2[%c0_86, %c0_87, %c13, %c0_88] : memref<1x4x16x16xf32, #tpu.memory_space<vmem>>, vector<1x4x1x16xf32>
    %153 = vector.shape_cast %152 : vector<1x4x1x16xf32> to vector<4x16xf32>
    %cst_89 = arith.constant dense<0.000000e+00> : vector<4x16xf32>
    %154 = tpu.matmul %3, %153, %cst_89 {dimension_numbers = #tpu.dot_dimension_numbers<[1], [0], [0], [1], [0, 0, 1, 1], [], []>} : vector<4x4xf32>, vector<4x16xf32>, vector<4x16xf32> -> vector<4x16xf32>
    %155 = arith.addf %154, %7 : vector<4x16xf32>
    %156 = arith.negf %155 : vector<4x16xf32>
    %157 = math.exp %156 : vector<4x16xf32>
    %cst_90 = arith.constant 1.000000e+00 : f32
    %158 = vector.broadcast %cst_90 : f32 to vector<4x16xf32>
    %159 = arith.addf %158, %157 : vector<4x16xf32>
    %160 = arith.divf %158, %159 : vector<4x16xf32>
    %cst_91 = arith.constant dense<0.000000e+00> : vector<4x16xf32>
    %161 = tpu.matmul %4, %160, %cst_91 {dimension_numbers = #tpu.dot_dimension_numbers<[1], [0], [0], [1], [0, 0, 1, 1], [], []>} : vector<4x4xf32>, vector<4x16xf32>, vector<4x16xf32> -> vector<4x16xf32>
    %162 = arith.maximumf %151, %161 : vector<4x16xf32>
    %c0_92 = arith.constant 0 : index
    %c0_93 = arith.constant 0 : index
    %c14 = arith.constant 14 : index
    %c0_94 = arith.constant 0 : index
    %163 = vector.load %arg2[%c0_92, %c0_93, %c14, %c0_94] : memref<1x4x16x16xf32, #tpu.memory_space<vmem>>, vector<1x4x1x16xf32>
    %164 = vector.shape_cast %163 : vector<1x4x1x16xf32> to vector<4x16xf32>
    %cst_95 = arith.constant dense<0.000000e+00> : vector<4x16xf32>
    %165 = tpu.matmul %3, %164, %cst_95 {dimension_numbers = #tpu.dot_dimension_numbers<[1], [0], [0], [1], [0, 0, 1, 1], [], []>} : vector<4x4xf32>, vector<4x16xf32>, vector<4x16xf32> -> vector<4x16xf32>
    %166 = arith.addf %165, %7 : vector<4x16xf32>
    %167 = arith.negf %166 : vector<4x16xf32>
    %168 = math.exp %167 : vector<4x16xf32>
    %cst_96 = arith.constant 1.000000e+00 : f32
    %169 = vector.broadcast %cst_96 : f32 to vector<4x16xf32>
    %170 = arith.addf %169, %168 : vector<4x16xf32>
    %171 = arith.divf %169, %170 : vector<4x16xf32>
    %cst_97 = arith.constant dense<0.000000e+00> : vector<4x16xf32>
    %172 = tpu.matmul %4, %171, %cst_97 {dimension_numbers = #tpu.dot_dimension_numbers<[1], [0], [0], [1], [0, 0, 1, 1], [], []>} : vector<4x4xf32>, vector<4x16xf32>, vector<4x16xf32> -> vector<4x16xf32>
    %173 = arith.maximumf %162, %172 : vector<4x16xf32>
    %c0_98 = arith.constant 0 : index
    %c0_99 = arith.constant 0 : index
    %c15 = arith.constant 15 : index
    %c0_100 = arith.constant 0 : index
    %174 = vector.load %arg2[%c0_98, %c0_99, %c15, %c0_100] : memref<1x4x16x16xf32, #tpu.memory_space<vmem>>, vector<1x4x1x16xf32>
    %175 = vector.shape_cast %174 : vector<1x4x1x16xf32> to vector<4x16xf32>
    %cst_101 = arith.constant dense<0.000000e+00> : vector<4x16xf32>
    %176 = tpu.matmul %3, %175, %cst_101 {dimension_numbers = #tpu.dot_dimension_numbers<[1], [0], [0], [1], [0, 0, 1, 1], [], []>} : vector<4x4xf32>, vector<4x16xf32>, vector<4x16xf32> -> vector<4x16xf32>
    %177 = arith.addf %176, %7 : vector<4x16xf32>
    %178 = arith.negf %177 : vector<4x16xf32>
    %179 = math.exp %178 : vector<4x16xf32>
    %cst_102 = arith.constant 1.000000e+00 : f32
    %180 = vector.broadcast %cst_102 : f32 to vector<4x16xf32>
    %181 = arith.addf %180, %179 : vector<4x16xf32>
    %182 = arith.divf %180, %181 : vector<4x16xf32>
    %cst_103 = arith.constant dense<0.000000e+00> : vector<4x16xf32>
    %183 = tpu.matmul %4, %182, %cst_103 {dimension_numbers = #tpu.dot_dimension_numbers<[1], [0], [0], [1], [0, 0, 1, 1], [], []>} : vector<4x4xf32>, vector<4x16xf32>, vector<4x16xf32> -> vector<4x16xf32>
    %184 = arith.maximumf %173, %183 : vector<4x16xf32>
    %c0_104 = arith.constant 0 : index
    %c0_105 = arith.constant 0 : index
    %185 = vector.load %arg13[%c0_104, %c0_105] : memref<4x16xf32, #tpu.memory_space<vmem>>, vector<4x16xf32>
    tpu.vector_store %arg13[%c0_104, %c0_105], %184 {strides = array<i32>} : memref<4x16xf32, #tpu.memory_space<vmem>>, vector<4x16xf32>,
    %c0_i32_106 = arith.constant 0 : i32
    %186 = arith.cmpi eq, %arg1, %c0_i32_106 : i32
    %187 = arith.extui %186 : i1 to i32
    %c0_i32_107 = arith.constant 0 : i32
    %188 = arith.cmpi ne, %187, %c0_i32_107 : i32
    scf.if %188 {
      %c0_108 = arith.constant 0 : index
      %c0_109 = arith.constant 0 : index
      %189 = vector.load %arg10[%c0_108, %c0_109] : memref<8x3xf32, #tpu.memory_space<vmem>>, vector<8x3xf32>
      %c0_110 = arith.constant 0 : index
      %c0_111 = arith.constant 0 : index
      %190 = vector.load %arg13[%c0_110, %c0_111] : memref<4x16xf32, #tpu.memory_space<vmem>>, vector<4x16xf32>
      %c0_112 = arith.constant 0 : index
      %c0_113 = arith.constant 0 : index
      %191 = vector.load %arg6[%c0_112, %c0_113] : memref<8x4xf32, #tpu.memory_space<vmem>>, vector<8x4xf32>
      %cst_114 = arith.constant dense<0.000000e+00> : vector<8x16xf32>
      %192 = tpu.matmul %191, %190, %cst_114 {dimension_numbers = #tpu.dot_dimension_numbers<[1], [0], [0], [1], [0, 0, 1, 1], [], []>} : vector<8x4xf32>, vector<4x16xf32>, vector<8x16xf32> -> vector<8x16xf32>
      %193 = vector.extract_strided_slice %189 {offsets = [0, 0], sizes = [8, 1], strides = [1, 1]} : vector<8x3xf32> to vector<8x1xf32>
      %194 = vector.broadcast %193 : vector<8x1xf32> to vector<8x16xf32>
      %195 = arith.addf %192, %194 : vector<8x16xf32>
      %cst_115 = arith.constant 0.000000e+00 : f32
      %196 = vector.broadcast %cst_115 : f32 to vector<8x16xf32>
      %197 = arith.maximumf %195, %196 : vector<8x16xf32>
      %c0_116 = arith.constant 0 : index
      %c0_117 = arith.constant 0 : index
      %198 = vector.load %arg7[%c0_116, %c0_117] : memref<8x24xf32, #tpu.memory_space<vmem>>, vector<8x24xf32>
      %199 = vector.extract_strided_slice %189 {offsets = [0, 1], sizes = [8, 1], strides = [1, 1]} : vector<8x3xf32> to vector<8x1xf32>
      %cst_118 = arith.constant 0.000000e+00 : f32
      %200 = vector.broadcast %cst_118 : f32 to vector<8x1xf32>
      %201 = vector.extract_strided_slice %197 {offsets = [0, 0], sizes = [8, 15], strides = [1, 1]} : vector<8x16xf32> to vector<8x15xf32>
      %202 = tpu.concatenate %200, %201 in 1 : vector<8x1xf32>, vector<8x15xf32> -> vector<8x16xf32>
      %203 = vector.extract_strided_slice %197 {offsets = [0, 1], sizes = [8, 15], strides = [1, 1]} : vector<8x16xf32> to vector<8x15xf32>
      %204 = tpu.concatenate %203, %200 in 1 : vector<8x15xf32>, vector<8x1xf32> -> vector<8x16xf32>
      %205 = tpu.concatenate %202, %197, %204 in 0 : vector<8x16xf32>, vector<8x16xf32>, vector<8x16xf32> -> vector<24x16xf32>
      %cst_119 = arith.constant dense<0.000000e+00> : vector<8x16xf32>
      %206 = tpu.matmul %198, %205, %cst_119 {dimension_numbers = #tpu.dot_dimension_numbers<[1], [0], [0], [1], [0, 0, 1, 1], [], []>} : vector<8x24xf32>, vector<24x16xf32>, vector<8x16xf32> -> vector<8x16xf32>
      %207 = vector.broadcast %199 : vector<8x1xf32> to vector<8x16xf32>
      %208 = arith.addf %206, %207 : vector<8x16xf32>
      %cst_120 = arith.constant 0.000000e+00 : f32
      %209 = vector.broadcast %cst_120 : f32 to vector<8x16xf32>
      %210 = arith.maximumf %208, %209 : vector<8x16xf32>
      %c0_121 = arith.constant 0 : index
      %c0_122 = arith.constant 0 : index
      %211 = vector.load %arg8[%c0_121, %c0_122] : memref<8x24xf32, #tpu.memory_space<vmem>>, vector<8x24xf32>
      %212 = vector.extract_strided_slice %189 {offsets = [0, 2], sizes = [8, 1], strides = [1, 1]} : vector<8x3xf32> to vector<8x1xf32>
      %cst_123 = arith.constant 0.000000e+00 : f32
      %213 = vector.broadcast %cst_123 : f32 to vector<8x1xf32>
      %214 = vector.extract_strided_slice %210 {offsets = [0, 0], sizes = [8, 15], strides = [1, 1]} : vector<8x16xf32> to vector<8x15xf32>
      %215 = tpu.concatenate %213, %214 in 1 : vector<8x1xf32>, vector<8x15xf32> -> vector<8x16xf32>
      %216 = vector.extract_strided_slice %210 {offsets = [0, 1], sizes = [8, 15], strides = [1, 1]} : vector<8x16xf32> to vector<8x15xf32>
      %217 = tpu.concatenate %216, %213 in 1 : vector<8x15xf32>, vector<8x1xf32> -> vector<8x16xf32>
      %218 = tpu.concatenate %215, %210, %217 in 0 : vector<8x16xf32>, vector<8x16xf32>, vector<8x16xf32> -> vector<24x16xf32>
      %cst_124 = arith.constant dense<0.000000e+00> : vector<8x16xf32>
      %219 = tpu.matmul %211, %218, %cst_124 {dimension_numbers = #tpu.dot_dimension_numbers<[1], [0], [0], [1], [0, 0, 1, 1], [], []>} : vector<8x24xf32>, vector<24x16xf32>, vector<8x16xf32> -> vector<8x16xf32>
      %220 = vector.broadcast %212 : vector<8x1xf32> to vector<8x16xf32>
      %221 = arith.addf %219, %220 : vector<8x16xf32>
      %cst_125 = arith.constant 0.000000e+00 : f32
      %222 = vector.broadcast %cst_125 : f32 to vector<8x16xf32>
      %223 = arith.maximumf %221, %222 : vector<8x16xf32>
      %224 = arith.addf %223, %197 : vector<8x16xf32>
      %c0_126 = arith.constant 0 : index
      %c0_127 = arith.constant 0 : index
      %225 = vector.load %arg9[%c0_126, %c0_127] : memref<4x8xf32, #tpu.memory_space<vmem>>, vector<4x8xf32>
      %cst_128 = arith.constant dense<0.000000e+00> : vector<4x16xf32>
      %226 = tpu.matmul %225, %224, %cst_128 {dimension_numbers = #tpu.dot_dimension_numbers<[1], [0], [0], [1], [0, 0, 1, 1], [], []>} : vector<4x8xf32>, vector<8x16xf32>, vector<4x16xf32> -> vector<4x16xf32>
      %c0_129 = arith.constant 0 : index
      %c0_130 = arith.constant 0 : index
      %227 = vector.load %arg11[%c0_129, %c0_130] : memref<4x1xf32, #tpu.memory_space<vmem>>, vector<4x1xf32>
      %228 = vector.broadcast %227 : vector<4x1xf32> to vector<4x16xf32>
      %229 = arith.addf %226, %228 : vector<4x16xf32>
      %cst_131 = arith.constant 0.000000e+00 : f32
      %230 = vector.broadcast %cst_131 : f32 to vector<4x16xf32>
      %231 = arith.maximumf %229, %230 : vector<4x16xf32>
      %c0_132 = arith.constant 0 : index
      %c0_133 = arith.constant 0 : index
      %c0_134 = arith.constant 0 : index
      %232 = vector.load %arg12[%c0_132, %c0_133, %c0_134] : memref<1x4x16xf32, #tpu.memory_space<vmem>>, vector<1x4x16xf32>
      %233 = vector.shape_cast %232 : vector<1x4x16xf32> to vector<4x16xf32>
      %234 = vector.shape_cast %231 : vector<4x16xf32> to vector<1x4x16xf32>
      tpu.vector_store %arg12[%c0_132, %c0_133, %c0_134], %234 {strides = array<i32>} : memref<1x4x16xf32, #tpu.memory_space<vmem>>, vector<1x4x16xf32>,
    } else {
    }
    return
  }
  func.func @transform_0(%arg0: i32, %arg1: i32) -> (i32, i32, i32, i32) {
    %c0_i32 = arith.constant 0 : i32
    %c0_i32_0 = arith.constant 0 : i32
    %c0_i32_1 = arith.constant 0 : i32
    return %arg0, %c0_i32, %arg1, %c0_i32_0 : i32, i32, i32, i32
  }
  func.func @transform_1(%arg0: i32, %arg1: i32) -> (i32, i32) {
    %c0_i32 = arith.constant 0 : i32
    %c0_i32_0 = arith.constant 0 : i32
    %c0_i32_1 = arith.constant 0 : i32
    return %c0_i32, %c0_i32_0 : i32, i32
  }
  func.func @transform_2(%arg0: i32, %arg1: i32) -> (i32, i32) {
    %c0_i32 = arith.constant 0 : i32
    %c0_i32_0 = arith.constant 0 : i32
    %c0_i32_1 = arith.constant 0 : i32
    return %c0_i32, %c0_i32_0 : i32, i32
  }
  func.func @transform_3(%arg0: i32, %arg1: i32) -> (i32, i32) {
    %c0_i32 = arith.constant 0 : i32
    %c0_i32_0 = arith.constant 0 : i32
    %c0_i32_1 = arith.constant 0 : i32
    return %c0_i32, %c0_i32_0 : i32, i32
  }
  func.func @transform_4(%arg0: i32, %arg1: i32) -> (i32, i32) {
    %c0_i32 = arith.constant 0 : i32
    %c0_i32_0 = arith.constant 0 : i32
    %c0_i32_1 = arith.constant 0 : i32
    return %c0_i32, %c0_i32_0 : i32, i32
  }
  func.func @transform_5(%arg0: i32, %arg1: i32) -> (i32, i32) {
    %c0_i32 = arith.constant 0 : i32
    %c0_i32_0 = arith.constant 0 : i32
    %c0_i32_1 = arith.constant 0 : i32
    return %c0_i32, %c0_i32_0 : i32, i32
  }
  func.func @transform_6(%arg0: i32, %arg1: i32) -> (i32, i32) {
    %c0_i32 = arith.constant 0 : i32
    %c0_i32_0 = arith.constant 0 : i32
    %c0_i32_1 = arith.constant 0 : i32
    return %c0_i32, %c0_i32_0 : i32, i32
  }
  func.func @transform_7(%arg0: i32, %arg1: i32) -> (i32, i32) {
    %c0_i32 = arith.constant 0 : i32
    %c0_i32_0 = arith.constant 0 : i32
    %c0_i32_1 = arith.constant 0 : i32
    return %c0_i32, %c0_i32_0 : i32, i32
  }
  func.func @transform_8(%arg0: i32, %arg1: i32) -> (i32, i32) {
    %c0_i32 = arith.constant 0 : i32
    %c0_i32_0 = arith.constant 0 : i32
    %c0_i32_1 = arith.constant 0 : i32
    return %c0_i32, %c0_i32_0 : i32, i32
  }
  func.func @transform_9(%arg0: i32, %arg1: i32) -> (i32, i32) {
    %c0_i32 = arith.constant 0 : i32
    %c0_i32_0 = arith.constant 0 : i32
    %c0_i32_1 = arith.constant 0 : i32
    return %c0_i32, %c0_i32_0 : i32, i32
  }
  func.func @transform_10(%arg0: i32, %arg1: i32) -> (i32, i32, i32) {
    %c0_i32 = arith.constant 0 : i32
    %c0_i32_0 = arith.constant 0 : i32
    %c0_i32_1 = arith.constant 0 : i32
    return %arg0, %c0_i32, %c0_i32_0 : i32, i32, i32
  }
}

</mosaic_0001>

<bundles_post_ra>
// kernel: tpu_custom_call.1
= control target key start
LH: loop header
LB: loop body
LE: loop exit
PB: predicated region body
PF: predicated region fallthrough
CT: control target
= control target key end

     0   :  { %15 = vsyncpa [#allocation4], 0  ;;  %s4795_s0 = inlined_call_operand.hbm [shape: f32[2,4,16,16], index: 0, kind: input, shape index: {}]   ;;  %s4796_s1 = inlined_call_operand.vmem [shape: f32[4,4], index: 1, kind: input, shape index: {}]   ;;  %s4797_s2 = inlined_call_operand.vmem [shape: f32[4,1], index: 2, kind: input, shape index: {}]   ;;  %s4798_s3 = inlined_call_operand.vmem [shape: f32[4,4], index: 3, kind: input, shape index: {}]   ;;  %s4799_s4 = inlined_call_operand.vmem [shape: f32[8,4], index: 4, kind: input, shape index: {}]   ;;  %s4800_s5 = inlined_call_operand.vmem [shape: f32[8,24], index: 5, kind: input, shape index: {}]   ;;  %s4801_s6 = inlined_call_operand.vmem [shape: f32[8,24], index: 6, kind: input, shape index: {}]   ;;  %s4802_s7 = inlined_call_operand.vmem [shape: f32[4,8], index: 7, kind: input, shape index: {}]   ;;  %s4803_s8 = inlined_call_operand.vmem [shape: f32[8,3], index: 8, kind: input, shape index: {}]   ;;  %s4804_s9 = inlined_call_operand.vmem [shape: f32[4,1], index: 9, kind: input, shape index: {}]   ;;  %s4805_s10 = inlined_call_operand.hbm [shape: f32[2,4,16], index: 10, kind: output, shape index: {}]  }
   0x1   :  { %17 = vsyncpa [#allocation4 + $0x1], 0 }
   0x2   :  { %18 = vsyncpa [#allocation5], 0 }
   0x3   :  { %20 = vsyncpa [#allocation5 + $0x1], 0  ;;  %s4229_s13 = smov 0   ;;  %s4231_s14 = smov 0  }
   0x4   :  { %s4233_s15 = smov 0   ;;  %s4235_s16 = smov 0  }
   0x5   :  { %s4237_s17 = smov 0   ;;  %s4239_s18 = smov 0  }
   0x6 LB: > { %4809 = sst [smem:[#allocation9_spill]] %s4154_s17  ;;  %s3525_s19 = sadd.s32 4294967295, %s4158_s18   ;;  %s4158_s18 = sphi %s4239_s18, %s26_s18   ;;  %s4154_s17 = sphi %s4237_s17, %s4823_s17   ;;  %s4150_s16 = sphi %s4235_s16, %s4822_s16   ;;  %s4146_s15 = sphi %s4233_s15, %s4826_s15   ;;  %s4142_s14 = sphi %s4231_s14, %s4825_s14   ;;  %s4138_s13 = sphi %s4229_s13, %s4824_s13  }
   0x7   : > { %s3526_s20 = sadd.s32 4294967294, %s4158_s18   ;;  %s38_s21 = sadd.s32 1, %s4154_s17 }
   0x8   : > { %s47_s22 = sadd.s32 1, %s4146_s15  ;;  %p40_p0 = scmp.ge.s32.totalorder %s38_s21, 2 }
   0x9   : > { %p54_p1 = scmp.ne.s32.totalorder %s4146_s15, %s4142_s14  ;;  %p55_p2 = scmp.eq.s32.totalorder %s4158_s18, 0 }
   0xa   : > { %p60_p3 = scmp.ne.s32.totalorder %s4142_s14, %s4138_s13  ;;  %s4828_s21 = smov (%p40_p0, %s38_s21), 0 }
   0xb   : > { %4810 = sst [smem:[#allocation10_spill]] %s4828_s21  ;;  %p4270_p4 = por %p55_p2, %p54_p1 }
   0xc   : > { %p61_p5 = scmp.eq.s32.totalorder %s3525_s19, 0  ;;  %s42_s24 = ssub.s32 %s4154_s17, %s4828_s21 }
   0xd   : > { %p273_p6 = scmp.eq.s32.totalorder %s3525_s19, 1  ;;  %p45_p7 = scmp.eq.s32.totalorder %s42_s24, 0 }
   0xe   : > { %p4276_p8 = por %p61_p5, %p60_p3  ;;  %p279_p10 = scmp.eq.s32.totalorder %s3526_s20, 1 }
   0xf   : > { %p4280_p9 = por %p273_p6, %p54_p1  ;;  %p3915_p13 = scmp.lt.s32.totalorder %s4158_s18, 2 }
  0x10   : > { %s4285_s27 = scalar_select %p45_p7, %s4146_s15, %s47_s22  }
  0x11   : > { %s4813_s26 = scalar_select %p4280_p9, 1, 0 }
  0x12   : > { %p4287_p11 = por %p279_p10, %p60_p3  ;;  %s326_s29 = sand.u32 1, %s4146_s15  }
  0x13   : > { %s3529_s30 = sshll.u32 %s326_s29, 6  ;;  %s3630_s11 = sshll.u32 %s4154_s17, 10 }
  0x14   : > { %s4814_s28 = scalar_select %p4287_p11, 1, 0 }
  0x15   : > { %s4298_s24 = scalar_lea.hbm %s4795_s0, %s3630_s11  ;;  %s330_s20 = scalar_lea.vmem [#allocation3], %s3529_s30 }
  0x16   : > { %s339_s22 = sshll.u32 %s330_s20, 4  ;;  %p4304_p0 = pnand %p3915_p13, %p4270_p4  ;;  %s4300_s22 = int_to_ptr.vmem [resolvable:$true] %s339_s22 }
  0x17   : > { %s4309_s17 = scalar_lea.sflag [#allocation4], %s326_s29  ;;  %s4046_s11 = scalar_lea.hbm %s4298_s24, 1024 }
  0x18   : > { %p4047_p2 = scmp.ne.s32.totalorder %s4298_s24, %s4046_s11  ;;  %p4048_p3 = pneg %p4304_p0 }
  0x19   : > { %s4051_s23 = scalar_lea.hbm %s4795_s0, 2048  ;;  %p4052_p4 = scmp.lt.u32.totalorder %s4298_s24, %s4795_s0 }
  0x1a   : > { %p4049_p5 = pnand %p4048_p3, %p4047_p2  ;;  %p4053_p7 = scmp.lt.u32.totalorder %s4051_s23, %s4046_s11 }
  0x1b   : > { %p4055_p13 = scmp.lt.u32.totalorder %s4046_s11, %s4298_s24 }
  0x1c   : > { %p4050_p6 = pneg %p4049_p5  ;;  %p4054_p10 = por %p4053_p7, %p4052_p4 }
  0x1e   : > { %p4056_p12 = por %p4055_p13, %p4054_p10 }
  0x20   : > { %p4057_p1 = pnand %p4056_p12, %p4050_p6 }
  0x22   : > { %4060 = shalt.err (!%p4057_p1)
}
  0x23   : > { %s4061_s29 = scalar_lea.vmem %s4300_s22, 1024  ;;  %s4160_s30 = smov [#allocation3]  }
  0x24   : > { %p4062_p2 = scmp.ne.s32.totalorder %s4300_s22, %s4061_s29  ;;  %s4066_s12 = sshll.u32 %s4160_s30, 4  ;;  %s4067_s12 = int_to_ptr.vmem [resolvable:$false] %s4066_s12 }
  0x25   : > { %s4068_s19 = scalar_lea.vmem %s4067_s12, 2048  ;;  %p4069_p9 = scmp.lt.s32.totalorder %s4300_s22, %s4067_s12 }
  0x26   : > { %p4064_p5 = pnand %p4062_p2, %p4048_p3  ;;  %p4070_p4 = scmp.lt.s32.totalorder %s4068_s19, %s4061_s29 }
  0x28   : > { %p4065_p11 = pneg %p4064_p5  ;;  %p4071_p7 = por %p4070_p4, %p4069_p9 }
  0x2a   : > { %p4072_p10 = pnand %p4071_p7, %p4065_p11 }
  0x2c   : > { %4075 = shalt.err (!%p4072_p10)
}
  0x2d   : > { %s4161_s11 = smov 128   ;;  %s4162_s23 = smov 8  }
  0x2e   : > { %3910 = dma.hbm_to_vmem [thread:$0]  (!%p4304_p0), %s4298_s24, 1024, %s4300_s22, %s4309_s17, %s4161_s11, %s4161_s11, %s4162_s23  }
  0x2f   : > { %p347_p12 = scmp.lt.s32.totalorder %s4158_s18, 3  ;;  %p4816_p1 = scmp.ge.s32.totalorder %s4158_s18, 1 }
  0x31   : > { %p348_p3 = pnand %p4816_p1, %p347_p12 }
  0x32   : > { %s4341_s20 = sand.u32 (!%p348_p3), 1, %s4142_s14  }
  0x33   : > { %351 = sbr.rel (%p348_p3) target bundleno = 1716 (0x6b4), region = 60  ;;  %s3533_s29 = sshll.u32 (!%p348_p3), %s4341_s20, 6 }
  0x34   : > { %s354_s30 = scalar_lea.sflag (!%p348_p3), [#allocation4], %s4341_s20  ;;  %s4345_s12 = scalar_lea.vmem (!%p348_p3), [#allocation3], %s3533_s29 }
  0x3a   : > { %4129 = dma.done.wait (%p4276_p8), %s354_s30, 1024  }
  0x3b   : > { %4131 = vsyncadd (%p4276_p8), %s354_s30, 4294966272  ;;  %v4163_v0 = vmov 0.0   ;;  %vm4164_vm0 = vmmov 0   ;;  %v4165_v1 = vmov 0   ;;  %vm419_vm1 = vcmask 1041409   ;;  %s4170_s17 = smov 127  }
  0x3c   : > { %3707 = vmatprep.subr.mxu0 %v4163_v0  ;;  %3712 = vmatprep.subr.mxu1 %v4163_v0  ;;  %v410_v2 = vld [vmem:[%s4345_s12] sm:$0x1]  ;;  %v411_v3 = vld [vmem:[%s4345_s12 + $0x10] sm:$0x1]  ;;  %vm422_vm2 = vcmask 1042434   ;;  %vm425_vm3 = vcmask 1043459  }
  0x3d   : > { %3709 = vmatprep.mubr.msk.f32.mxu0 %vm4164_vm0, %v4163_v0  ;;  %3977 = vset.pattern.permute.xlu0 %v4165_v1  ;;  %v412_v4 = vld [vmem:[%s4345_s12 + $0x20] sm:$0x1]  ;;  %v413_v5 = vld [vmem:[%s4345_s12 + $0x30] sm:$0x1]  ;;  %v418_v6 = vrot.slane %v411_v3, 7  ;;  %vm431_vm4 = vcmask 1043456  }
  0x3e   : > { %3714 = vmatprep.mubr.msk.f32.mxu1 %vm4164_vm0, %v4163_v0  ;;  %3980 = vset.pattern.permute.xlu1 %v4165_v1  ;;  %v421_v7 = vrot.slane %v412_v4, 6  ;;  %v424_v8 = vrot.slane %v413_v5, 5  ;;  %v4366_v9 = vld [vmem:[%s4796_s1] sm:$0xf]  ;;  %v587_v10 = vld [vmem:[%s4345_s12 + $0x1] sm:$0x1] }
  0x3f   : > { %v588_v11 = vld [vmem:[%s4345_s12 + $0x11] sm:$0x1]  ;;  %v420_v12 = vsel %vm419_vm1, %v418_v6, %v410_v2  ;;  %vm427_vm5 = vcmask 31744   ;;  %v589_v13 = vld [vmem:[%s4345_s12 + $0x21] sm:$0x1]  ;;  %vm399_vm6 = vcmask 125952  }
  0x40   : > { %v590_v14 = vld [vmem:[%s4345_s12 + $0x31] sm:$0x1]  ;;  %v595_v15 = vrot.slane %v588_v11, 7  ;;  %v423_v16 = vsel %vm422_vm2, %v421_v7, %v420_v12  ;;  %v597_v17 = vrot.slane %v589_v13, 6  ;;  %v753_v19 = vld [vmem:[%s4345_s12 + $0x2] sm:$0x1] }
  0x41   : > { %v599_v18 = vrot.slane %v590_v14, 5  ;;  %v754_v20 = vld [vmem:[%s4345_s12 + $0x12] sm:$0x1]  ;;  %v426_v21 = vsel %vm425_vm3, %v424_v8, %v423_v16  ;;  %v755_v23 = vld [vmem:[%s4345_s12 + $0x22] sm:$0x1]  ;;  %vm3172_vm7 = vcmask 7168  }
  0x42   : > { %v596_v22 = vsel %vm419_vm1, %v595_v15, %v587_v10  ;;  %v756_v24 = vld [vmem:[%s4345_s12 + $0x32] sm:$0x1]  ;;  %v761_v25 = vrot.slane %v754_v20, 7  ;;  %3708 = vmatpush3.msk.msra.mxu0 %vm431_vm4, %v426_v21  ;;  %v763_v27 = vrot.slane %v755_v23, 6  ;;  %v919_v29 = vld [vmem:[%s4345_s12 + $0x3] sm:$0x1]  ;;  %vm3617_vm8 = vmneg %vm3172_vm7 }
  0x43   : > { %v598_v26 = vsel %vm422_vm2, %v597_v17, %v596_v22  ;;  %v765_v28 = vrot.slane %v756_v24, 5  ;;  %v920_v30 = vld [vmem:[%s4345_s12 + $0x13] sm:$0x1]  ;;  %3710 = vmatmul.mubr.msk.f32.vlgmr.msra.gmra.mrb[0].mxu0 %vm427_vm5, %v4366_v9  ;;  %3717 = vmatprep.subr.mxu0 %v4163_v0  ;;  %v921_v33 = vld [vmem:[%s4345_s12 + $0x23] sm:$0x1]  ;;  %vm4171_vm9 = vmmov 1  }
  0x44   : > { %v600_v31 = vsel %vm425_vm3, %v599_v18, %v598_v26  ;;  %v762_v32 = vsel %vm419_vm1, %v761_v25, %v753_v19  ;;  %v922_v34 = vld [vmem:[%s4345_s12 + $0x33] sm:$0x1]  ;;  %v927_v35 = vrot.slane %v920_v30, 7  ;;  %3719 = vmatprep.mubr.msk.f32.mxu0 %vm4164_vm0, %v4163_v0  ;;  %v929_v37 = vrot.slane %v921_v33, 6  ;;  %v1085_v38 = vld [vmem:[%s4345_s12 + $0x4] sm:$0x1]  ;;  %vm4709_vm10 = vmpackc.low %vm4171_vm9, %vm3617_vm8 }
  0x45   : > { %3718 = vmatpush3.msk.msra.mxu0 %vm431_vm4, %v600_v31  ;;  %v764_v36 = vsel %vm422_vm2, %v763_v27, %v762_v32  ;;  %v1086_v39 = vld [vmem:[%s4345_s12 + $0x14] sm:$0x1]  ;;  %v931_v42 = vrot.slane %v922_v34, 5  ;;  %v1087_v43 = vld [vmem:[%s4345_s12 + $0x24] sm:$0x1]  ;;  %vm3177_vm11 = vcmask 121856  }
  0x46   : > { %3727 = vmatprep.subr.mxu0 %v4163_v0  ;;  %v766_v40 = vsel %vm425_vm3, %v765_v28, %v764_v36  ;;  %v928_v41 = vsel %vm419_vm1, %v927_v35, %v919_v29  ;;  %v1093_v44 = vrot.slane %v1086_v39, 7  ;;  %v1088_v46 = vld [vmem:[%s4345_s12 + $0x34] sm:$0x1]  ;;  %v1095_v47 = vrot.slane %v1087_v43, 6  ;;  %v1252_v48 = vld [vmem:[%s4345_s12 + $0x15] sm:$0x1] }
  0x47   : > { %v930_v45 = vsel %vm422_vm2, %v929_v37, %v928_v41  ;;  %3720 = vmatmul.mubr.msk.f32.vlgmr.msra.gmra.mrb[2].mxu0 %vm427_vm5, %v4366_v9  ;;  %v1253_v50 = vld [vmem:[%s4345_s12 + $0x25] sm:$0x1]  ;;  %v1259_v51 = vrot.slane %v1252_v48, 7  ;;  %v1418_v53 = vld [vmem:[%s4345_s12 + $0x16] sm:$0x1]  ;;  %v1097_v55 = vrot.slane %v1088_v46, 5 }
  0x48   : > { %v1094_v49 = vsel %vm419_vm1, %v1093_v44, %v1085_v38  ;;  %3728 = vmatpush3.msk.msra.mxu0 %vm431_vm4, %v766_v40  ;;  %3729 = vmatprep.mubr.msk.f32.mxu0 %vm4164_vm0, %v4163_v0  ;;  %v1251_v52 = vld [vmem:[%s4345_s12 + $0x5] sm:$0x1]  ;;  %v932_v54 = vsel %vm425_vm3, %v931_v42, %v930_v45  ;;  %v1254_v57 = vld [vmem:[%s4345_s12 + $0x35] sm:$0x1]  ;;  %v1261_v58 = vrot.slane %v1253_v50, 6  ;;  %v1425_v61 = vrot.slane %v1418_v53, 7 }
  0x49   : > { %3737 = vmatprep.subr.mxu0 %v4163_v0  ;;  %v1096_v56 = vsel %vm422_vm2, %v1095_v47, %v1094_v49  ;;  %v1260_v59 = vsel %vm419_vm1, %v1259_v51, %v1251_v52  ;;  %v1419_v60 = vld [vmem:[%s4345_s12 + $0x26] sm:$0x1]  ;;  %v1584_v63 = vld [vmem:[%s4345_s12 + $0x17] sm:$0x1]  ;;  %v1263_v3 = vrot.slane %v1254_v57, 5  ;;  %v4488_v49 = vld [vmem:[%s4803_s8] sm:$0xff] }
  0x4a   : > { %v1417_v62 = vld [vmem:[%s4345_s12 + $0x6] sm:$0x1]  ;;  %v1098_v2 = vsel %vm425_vm3, %v1097_v55, %v1096_v56  ;;  %v1262_v4 = vsel %vm422_vm2, %v1261_v58, %v1260_v59  ;;  %v1420_v5 = vld [vmem:[%s4345_s12 + $0x36] sm:$0x1]  ;;  %v1427_v6 = vrot.slane %v1419_v60, 6  ;;  %v1591_v10 = vrot.slane %v1584_v63, 7 }
  0x4b   : > { %3730 = vmatmul.mubr.msk.f32.vlgmr.msra.gmra.mrb[4].mxu0 %vm427_vm5, %v4366_v9  ;;  %v1426_v7 = vsel %vm419_vm1, %v1425_v61, %v1417_v62  ;;  %v1585_v8 = vld [vmem:[%s4345_s12 + $0x27] sm:$0x1]  ;;  %v1750_v12 = vld [vmem:[%s4345_s12 + $0x18] sm:$0x1]  ;;  %v1264_v13 = vsel %vm425_vm3, %v1263_v3, %v1262_v4  ;;  %v1429_v14 = vrot.slane %v1420_v5, 5  ;;  %vm3183_vm12 = vcmask 195584  }
  0x4c   : > { %3738 = vmatpush3.msk.msra.mxu0 %vm431_vm4, %v932_v54  ;;  %3739 = vmatprep.mubr.msk.f32.mxu0 %vm4164_vm0, %v4163_v0  ;;  %v1583_v11 = vld [vmem:[%s4345_s12 + $0x7] sm:$0x1]  ;;  %v1428_v15 = vsel %vm422_vm2, %v1427_v6, %v1426_v7  ;;  %v1586_v16 = vld [vmem:[%s4345_s12 + $0x37] sm:$0x1]  ;;  %v1593_v17 = vrot.slane %v1585_v8, 6  ;;  %v1757_v20 = vrot.slane %v1750_v12, 7 }
  0x4d   : > { %3747 = vmatprep.subr.mxu0 %v4163_v0  ;;  %v1592_v18 = vsel %vm419_vm1, %v1591_v10, %v1583_v11  ;;  %v1751_v19 = vld [vmem:[%s4345_s12 + $0x28] sm:$0x1]  ;;  %v1916_v22 = vld [vmem:[%s4345_s12 + $0x19] sm:$0x1]  ;;  %v1430_v23 = vsel %vm425_vm3, %v1429_v14, %v1428_v15  ;;  %v1595_v24 = vrot.slane %v1586_v16, 5  ;;  %vm3354_vm13 = vcmask 64512  }
  0x4e   : > { %v1749_v21 = vld [vmem:[%s4345_s12 + $0x8] sm:$0x1]  ;;  %v1594_v25 = vsel %vm422_vm2, %v1593_v17, %v1592_v18  ;;  %v1752_v26 = vld [vmem:[%s4345_s12 + $0x38] sm:$0x1]  ;;  %v1759_v27 = vrot.slane %v1751_v19, 6  ;;  %v1923_v30 = vrot.slane %v1916_v22, 7 }
  0x4f   : > { %3740 = vmatmul.mubr.msk.f32.vlgmr.msra.gmra.mrb[6].mxu0 %vm427_vm5, %v4366_v9  ;;  %v1758_v28 = vsel %vm419_vm1, %v1757_v20, %v1749_v21  ;;  %v1917_v29 = vld [vmem:[%s4345_s12 + $0x29] sm:$0x1]  ;;  %v2082_v32 = vld [vmem:[%s4345_s12 + $0x1a] sm:$0x1]  ;;  %v1596_v33 = vsel %vm425_vm3, %v1595_v24, %v1594_v25  ;;  %v1761_v34 = vrot.slane %v1752_v26, 5  ;;  %s3534_s30 = sshll.u32 %s4341_s20, 2 }
  0x50   : > { %3748 = vmatpush3.msk.msra.mxu0 %vm431_vm4, %v1098_v2  ;;  %3749 = vmatprep.mubr.msk.f32.mxu0 %vm4164_vm0, %v4163_v0  ;;  %v1915_v31 = vld [vmem:[%s4345_s12 + $0x9] sm:$0x1]  ;;  %v1760_v35 = vsel %vm422_vm2, %v1759_v27, %v1758_v28  ;;  %v1918_v36 = vld [vmem:[%s4345_s12 + $0x39] sm:$0x1]  ;;  %v1925_v37 = vrot.slane %v1917_v29, 6  ;;  %v2089_v40 = vrot.slane %v2082_v32, 7 }
  0x51   : > { %3757 = vmatprep.subr.mxu0 %v4163_v0  ;;  %v1924_v38 = vsel %vm419_vm1, %v1923_v30, %v1915_v31  ;;  %v2083_v39 = vld [vmem:[%s4345_s12 + $0x2a] sm:$0x1]  ;;  %v2248_v42 = vld [vmem:[%s4345_s12 + $0x1b] sm:$0x1]  ;;  %v403_v43 = vld [vmem:[%s4797_s2] sm:$0xf]  ;;  %v1762_v44 = vsel %vm425_vm3, %v1761_v34, %v1760_v35 }
  0x52   : > { %v2081_v41 = vld [vmem:[%s4345_s12 + $0xa] sm:$0x1]  ;;  %v1927_v45 = vrot.slane %v1918_v36, 5  ;;  %406 = vperm.xlu0 %3977, %v403_v43   ;;  %v1926_v46 = vsel %vm422_vm2, %v1925_v37, %v1924_v38  ;;  %v2084_v47 = vld [vmem:[%s4345_s12 + $0x3a] sm:$0x1]  ;;  %v2091_v48 = vrot.slane %v2083_v39, 6 }
  0x53   : > { %3750 = vmatmul.mubr.msk.f32.vlgmr.msra.gmra.mrb[8].mxu0 %vm427_vm5, %v4366_v9  ;;  %v2090_v50 = vsel %vm419_vm1, %v2089_v40, %v2081_v41  ;;  %v2249_v51 = vld [vmem:[%s4345_s12 + $0x2b] sm:$0x1]  ;;  %v2255_v52 = vrot.slane %v2248_v42, 7  ;;  %v2414_v54 = vld [vmem:[%s4345_s12 + $0x1c] sm:$0x1]  ;;  %v2093_v56 = vrot.slane %v2084_v47, 5 }
  0x54   : > { %3758 = vmatpush3.msk.msra.mxu0 %vm431_vm4, %v1264_v13  ;;  %3759 = vmatprep.mubr.msk.f32.mxu0 %vm4164_vm0, %v4163_v0  ;;  %v2247_v53 = vld [vmem:[%s4345_s12 + $0xb] sm:$0x1]  ;;  %v1928_v55 = vsel %vm425_vm3, %v1927_v45, %v1926_v46  ;;  %v2092_v57 = vsel %vm422_vm2, %v2091_v48, %v2090_v50  ;;  %v2250_v58 = vld [vmem:[%s4345_s12 + $0x3b] sm:$0x1]  ;;  %v2257_v59 = vrot.slane %v2249_v51, 6  ;;  %v2421_v62 = vrot.slane %v2414_v54, 7 }
  0x55   : > { %3767 = vmatprep.subr.mxu0 %v4163_v0  ;;  %v2256_v60 = vsel %vm419_vm1, %v2255_v52, %v2247_v53  ;;  %v2415_v61 = vld [vmem:[%s4345_s12 + $0x2c] sm:$0x1]  ;;  %v2580_v2 = vld [vmem:[%s4345_s12 + $0x1d] sm:$0x1]  ;;  %v2094_v3 = vsel %vm425_vm3, %v2093_v56, %v2092_v57  ;;  %v2259_v4 = vrot.slane %v2250_v58, 5  ;;  %v4166_v43 = vmov -inf  }
  0x56   : > { %3087 = vperm.xlu0 %3977, %v4488_v49   ;;  %v2413_v63 = vld [vmem:[%s4345_s12 + $0xc] sm:$0x1]  ;;  %v2258_v5 = vsel %vm422_vm2, %v2257_v59, %v2256_v60  ;;  %v2416_v6 = vld [vmem:[%s4345_s12 + $0x3c] sm:$0x1]  ;;  %v2423_v7 = vrot.slane %v2415_v61, 6  ;;  %v2587_v11 = vrot.slane %v2580_v2, 7 }
  0x57   : > { %3760 = vmatmul.mubr.msk.f32.vlgmr.msra.gmra.mrb[10].mxu0 %vm427_vm5, %v4366_v9  ;;  %v2422_v8 = vsel %vm419_vm1, %v2421_v62, %v2413_v63  ;;  %v2581_v10 = vld [vmem:[%s4345_s12 + $0x2d] sm:$0x1]  ;;  %v2746_v13 = vld [vmem:[%s4345_s12 + $0x1e] sm:$0x1]  ;;  %v2260_v14 = vsel %vm425_vm3, %v2259_v4, %v2258_v5  ;;  %v2425_v15 = vrot.slane %v2416_v6, 5  ;;  %s3431_s19 = scalar_lea.sflag [#allocation5], %s4341_s20 }
  0x58   : > { %3768 = vmatpush3.msk.msra.mxu0 %vm431_vm4, %v1430_v23  ;;  %3769 = vmatprep.mubr.msk.f32.mxu0 %vm4164_vm0, %v4163_v0  ;;  %v2579_v12 = vld [vmem:[%s4345_s12 + $0xd] sm:$0x1]  ;;  %v2424_v16 = vsel %vm422_vm2, %v2423_v7, %v2422_v8  ;;  %v2582_v17 = vld [vmem:[%s4345_s12 + $0x3d] sm:$0x1]  ;;  %v2589_v18 = vrot.slane %v2581_v10, 6  ;;  %v2753_v21 = vrot.slane %v2746_v13, 7 }
  0x59   : > { %3777 = vmatprep.subr.mxu0 %v4163_v0  ;;  %v2588_v19 = vsel %vm419_vm1, %v2587_v11, %v2579_v12  ;;  %v2747_v20 = vld [vmem:[%s4345_s12 + $0x2e] sm:$0x1]  ;;  %v2912_v23 = vld [vmem:[%s4345_s12 + $0x1f] sm:$0x1]  ;;  %v2426_v24 = vsel %vm425_vm3, %v2425_v15, %v2424_v16  ;;  %v2591_v25 = vrot.slane %v2582_v17, 5  ;;  %p4819_p9 = scmp.ne.s32.totalorder %s4813_s26, 0 }
  0x5a   : > { %v2745_v22 = vld [vmem:[%s4345_s12 + $0xe] sm:$0x1]  ;;  %v2590_v26 = vsel %vm422_vm2, %v2589_v18, %v2588_v19  ;;  %v2748_v27 = vld [vmem:[%s4345_s12 + $0x3e] sm:$0x1]  ;;  %v2755_v28 = vrot.slane %v2747_v20, 6  ;;  %v2919_v31 = vrot.slane %v2912_v23, 7 }
  0x5b   : > { %3770 = vmatmul.mubr.msk.f32.vlgmr.msra.gmra.mrb[12].mxu0 %vm427_vm5, %v4366_v9  ;;  %v2754_v29 = vsel %vm419_vm1, %v2753_v21, %v2745_v22  ;;  %v2913_v30 = vld [vmem:[%s4345_s12 + $0x2f] sm:$0x1]  ;;  %v2757_v34 = vrot.slane %v2748_v27, 5  ;;  %v2914_v36 = vld [vmem:[%s4345_s12 + $0x3f] sm:$0x1] }
  0x5c   : > { %3778 = vmatpush3.msk.msra.mxu0 %vm431_vm4, %v1596_v33  ;;  %3779 = vmatprep.mubr.msk.f32.mxu0 %vm4164_vm0, %v4163_v0  ;;  %v2911_v32 = vld [vmem:[%s4345_s12 + $0xf] sm:$0x1]  ;;  %v2592_v33 = vsel %vm425_vm3, %v2591_v25, %v2590_v26  ;;  %v2756_v35 = vsel %vm422_vm2, %v2755_v28, %v2754_v29  ;;  %v2921_v37 = vrot.slane %v2913_v30, 6  ;;  %v2923_v40 = vrot.slane %v2914_v36, 5  ;;  %400 = vst.msk [vmem:[#allocation2] sm:$0xf] %vm399_vm6, %v4166_v43 }
  0x5d   : > { %3787 = vmatprep.subr.mxu0 %v4163_v0  ;;  %v2920_v38 = vsel %vm419_vm1, %v2919_v31, %v2911_v32  ;;  %v2758_v39 = vsel %vm425_vm3, %v2757_v34, %v2756_v35  ;;  %v4594_v19 = vld [vmem:[%s4798_s3] sm:$0xf]  ;;  %s4169_s12 = smov 1  }
  0x5e   : > { %v2922_v41 = vsel %vm422_vm2, %v2921_v37, %v2920_v38 }
  0x5f   : > { %3780 = vmatmul.mubr.msk.f32.vlgmr.msra.gmra.mrb[14].mxu0 %vm427_vm5, %v4366_v9  ;;  %v2924_v42 = vsel %vm425_vm3, %v2923_v40, %v2922_v41 }
  0x60   : > { %3788 = vmatpush3.msk.msra.mxu0 %vm431_vm4, %v1762_v44  ;;  %3789 = vmatprep.mubr.msk.f32.mxu0 %vm4164_vm0, %v4163_v0 }
  0x61   : > { %3797 = vmatprep.subr.mxu0 %v4163_v0 }
  0x63   : > { %3790 = vmatmul.mubr.msk.f32.vlgmr.msra.gmra.mrb[16].mxu0 %vm427_vm5, %v4366_v9 }
  0x64   : > { %3798 = vmatpush3.msk.msra.mxu0 %vm431_vm4, %v1928_v55  ;;  %3799 = vmatprep.mubr.msk.f32.mxu0 %vm4164_vm0, %v4163_v0 }
  0x65   : > { %3807 = vmatprep.subr.mxu0 %v4163_v0 }
  0x67   : > { %3800 = vmatmul.mubr.msk.f32.vlgmr.msra.gmra.mrb[18].mxu0 %vm427_vm5, %v4366_v9 }
  0x68   : > { %3808 = vmatpush3.msk.msra.mxu0 %vm431_vm4, %v2094_v3  ;;  %3809 = vmatprep.mubr.msk.f32.mxu0 %vm4164_vm0, %v4163_v0 }
  0x69   : > { %3817 = vmatprep.subr.mxu0 %v4163_v0 }
  0x6b   : > { %3810 = vmatmul.mubr.msk.f32.vlgmr.msra.gmra.mrb[20].mxu0 %vm427_vm5, %v4366_v9 }
  0x6c   : > { %3818 = vmatpush3.msk.msra.mxu0 %vm431_vm4, %v2260_v14  ;;  %3819 = vmatprep.mubr.msk.f32.mxu0 %vm4164_vm0, %v4163_v0 }
  0x6d   : > { %3827 = vmatprep.subr.mxu0 %v4163_v0 }
  0x6f   : > { %3820 = vmatmul.mubr.msk.f32.vlgmr.msra.gmra.mrb[22].mxu0 %vm427_vm5, %v4366_v9 }
  0x70   : > { %3828 = vmatpush3.msk.msra.mxu0 %vm431_vm4, %v2426_v24  ;;  %3829 = vmatprep.mubr.msk.f32.mxu0 %vm4164_vm0, %v4163_v0 }
  0x71   : > { %3837 = vmatprep.subr.mxu0 %v4163_v0 }
  0x73   : > { %3830 = vmatmul.mubr.msk.f32.vlgmr.msra.gmra.mrb[24].mxu0 %vm427_vm5, %v4366_v9 }
  0x74   : > { %3838 = vmatpush3.msk.msra.mxu0 %vm431_vm4, %v2592_v33  ;;  %3839 = vmatprep.mubr.msk.f32.mxu0 %vm4164_vm0, %v4163_v0 }
  0x75   : > { %3847 = vmatprep.subr.mxu0 %v4163_v0 }
  0x77   : > { %3840 = vmatmul.mubr.msk.f32.vlgmr.msra.gmra.mrb[26].mxu0 %vm427_vm5, %v4366_v9 }
  0x78   : > { %3848 = vmatpush3.msk.msra.mxu0 %vm431_vm4, %v2758_v39  ;;  %3849 = vmatprep.mubr.msk.f32.mxu0 %vm4164_vm0, %v4163_v0 }
  0x79   : > { %3857 = vmatprep.subr.mxu0 %v4163_v0 }
  0x7b   : > { %3850 = vmatmul.mubr.msk.f32.vlgmr.msra.gmra.mrb[28].mxu0 %vm427_vm5, %v4366_v9 }
  0x7c   : > { %3858 = vmatpush3.msk.msra.mxu0 %vm431_vm4, %v2924_v42  ;;  %3859 = vmatprep.mubr.msk.f32.mxu0 %vm4164_vm0, %v4163_v0 }
  0x7d   : > { %3867 = vmatprep.subr.mxu0 %v4163_v0 }
  0x7f   : > { %3860 = vmatmul.mubr.msk.f32.vlgmr.msra.gmra.mrb[30].mxu0 %vm427_vm5, %v4366_v9 }
  0x80   : > { %3869 = vmatprep.mubr.msk.f32.mxu0 %vm4164_vm0, %v4163_v0 }
  0xd1   : > { %v4582_v44 = vpop.permute.xlu0 %406 }
 0x116   : > { %v500_v45 = vpop.f32.mrb[0].mxu0 }
 0x117   : > { %v501_v46 = vadd.f32 %v500_v45, %v4582_v44  ;;  %v3711_v47 = vpop.f32.mrb[1].mxu0 }
 0x119   : > { %v3537_v48 = vmul.f32 -1.442695, %v501_v46 }
 0x11a   : > { %v669_v50 = vpop.f32.mrb[2].mxu0 }
 0x11b   : > { %3982 = vpow2.f32 %v3537_v48  ;;  %v670_v51 = vadd.f32 %v669_v50, %v4582_v44  ;;  %v3721_v52 = vpop.f32.mrb[3].mxu0 }
 0x11d   : > { %v3542_v9 = vmul.f32 -1.442695, %v670_v51 }
 0x11e   : > { %v835_v53 = vpop.f32.mrb[4].mxu0 }
 0x11f   : > { %3984 = vpow2.f32 %v3542_v9  ;;  %v836_v54 = vadd.f32 %v835_v53, %v4582_v44  ;;  %v3731_v55 = vpop.f32.mrb[5].mxu0 }
 0x121   : > { %v3547_v56 = vmul.f32 -1.442695, %v836_v54 }
 0x122   : > { %v1001_v57 = vpop.f32.mrb[6].mxu0 }
 0x123   : > { %3986 = vpow2.f32 %v3547_v56  ;;  %v1002_v58 = vadd.f32 %v1001_v57, %v4582_v44  ;;  %v3741_v59 = vpop.f32.mrb[7].mxu0 }
 0x125   : > { %v3983_v60 = vpop.eup %3982  ;;  %v3552_v61 = vmul.f32 -1.442695, %v1002_v58 }
 0x126   : > { %v507_v62 = vadd.f32 1.0, %v3983_v60  ;;  %v1167_v63 = vpop.f32.mrb[8].mxu0 }
 0x127   : > { %3988 = vpow2.f32 %v3552_v61  ;;  %v1168_v2 = vadd.f32 %v1167_v63, %v4582_v44  ;;  %v3751_v3 = vpop.f32.mrb[9].mxu0 }
 0x128   : > { %3990 = vrcp.f32 %v507_v62 }
 0x129   : > { %v3985_v4 = vpop.eup %3984  ;;  %v3557_v5 = vmul.f32 -1.442695, %v1168_v2 }
 0x12a   : > { %v676_v6 = vadd.f32 1.0, %v3985_v4  ;;  %v1333_v7 = vpop.f32.mrb[10].mxu0 }
 0x12b   : > { %3992 = vpow2.f32 %v3557_v5  ;;  %v1334_v8 = vadd.f32 %v1333_v7, %v4582_v44  ;;  %v3761_v10 = vpop.f32.mrb[11].mxu0 }
 0x12c   : > { %3994 = vrcp.f32 %v676_v6 }
 0x12d   : > { %v3987_v11 = vpop.eup %3986  ;;  %v3562_v12 = vmul.f32 -1.442695, %v1334_v8 }
 0x12e   : > { %v842_v13 = vadd.f32 1.0, %v3987_v11  ;;  %v1499_v14 = vpop.f32.mrb[12].mxu0 }
 0x12f   : > { %3996 = vpow2.f32 %v3562_v12  ;;  %v1500_v15 = vadd.f32 %v1499_v14, %v4582_v44  ;;  %v3771_v16 = vpop.f32.mrb[13].mxu0 }
 0x130   : > { %3998 = vrcp.f32 %v842_v13 }
 0x131   : > { %v3989_v17 = vpop.eup %3988  ;;  %v3567_v18 = vmul.f32 -1.442695, %v1500_v15 }
 0x132   : > { %v3991_v20 = vpop.eup %3990  ;;  %v1008_v21 = vadd.f32 1.0, %v3989_v17  ;;  %v1665_v22 = vpop.f32.mrb[14].mxu0 }
 0x133   : > { %4000 = vpow2.f32 %v3567_v18  ;;  %v1666_v23 = vadd.f32 %v1665_v22, %v4582_v44  ;;  %3713 = vmatpush3.msk.msra.mxu1 %vm431_vm4, %v3991_v20  ;;  %v3781_v24 = vpop.f32.mrb[15].mxu0 }
 0x134   : > { %4002 = vrcp.f32 %v1008_v21  ;;  %3715 = vmatmul.mubr.msk.f32.vlgmr.msra.gmra.mrb[0].mxu1 %vm427_vm5, %v4594_v19  ;;  %3722 = vmatprep.subr.mxu1 %v4163_v0 }
 0x135   : > { %v3993_v25 = vpop.eup %3992  ;;  %v3572_v26 = vmul.f32 -1.442695, %v1666_v23  ;;  %3724 = vmatprep.mubr.msk.f32.mxu1 %vm4164_vm0, %v4163_v0 }
 0x136   : > { %v3995_v27 = vpop.eup %3994  ;;  %v1174_v28 = vadd.f32 1.0, %v3993_v25  ;;  %v1831_v29 = vpop.f32.mrb[16].mxu0 }
 0x137   : > { %4004 = vpow2.f32 %v3572_v26  ;;  %v1832_v30 = vadd.f32 %v1831_v29, %v4582_v44  ;;  %3723 = vmatpush3.msk.msra.mxu1 %vm431_vm4, %v3995_v27  ;;  %v3791_v31 = vpop.f32.mrb[17].mxu0 }
 0x138   : > { %4006 = vrcp.f32 %v1174_v28  ;;  %3725 = vmatmul.mubr.msk.f32.vlgmr.msra.gmra.mrb[2].mxu1 %vm427_vm5, %v4594_v19  ;;  %3732 = vmatprep.subr.mxu1 %v4163_v0 }
 0x139   : > { %v3997_v32 = vpop.eup %3996  ;;  %v3577_v33 = vmul.f32 -1.442695, %v1832_v30  ;;  %3734 = vmatprep.mubr.msk.f32.mxu1 %vm4164_vm0, %v4163_v0 }
 0x13a   : > { %v3999_v34 = vpop.eup %3998  ;;  %v1340_v35 = vadd.f32 1.0, %v3997_v32  ;;  %v1997_v36 = vpop.f32.mrb[18].mxu0 }
 0x13b   : > { %4008 = vpow2.f32 %v3577_v33  ;;  %v1998_v37 = vadd.f32 %v1997_v36, %v4582_v44  ;;  %3733 = vmatpush3.msk.msra.mxu1 %vm431_vm4, %v3999_v34  ;;  %v3801_v38 = vpop.f32.mrb[19].mxu0 }
 0x13c   : > { %4010 = vrcp.f32 %v1340_v35  ;;  %3735 = vmatmul.mubr.msk.f32.vlgmr.msra.gmra.mrb[4].mxu1 %vm427_vm5, %v4594_v19  ;;  %3742 = vmatprep.subr.mxu1 %v4163_v0 }
 0x13d   : > { %v4001_v39 = vpop.eup %4000  ;;  %v3582_v40 = vmul.f32 -1.442695, %v1998_v37  ;;  %3744 = vmatprep.mubr.msk.f32.mxu1 %vm4164_vm0, %v4163_v0  ;;  %v409_v37 = vld [vmem:[#allocation2] sm:$0xf] }
 0x13e   : > { %v4003_v41 = vpop.eup %4002  ;;  %v1506_v42 = vadd.f32 1.0, %v4001_v39  ;;  %v2163_v43 = vpop.f32.mrb[20].mxu0 }
 0x13f   : > { %4012 = vpow2.f32 %v3582_v40  ;;  %v2164_v45 = vadd.f32 %v2163_v43, %v4582_v44  ;;  %3743 = vmatpush3.msk.msra.mxu1 %vm431_vm4, %v4003_v41  ;;  %v3811_v46 = vpop.f32.mrb[21].mxu0 }
 0x140   : > { %4014 = vrcp.f32 %v1506_v42  ;;  %3745 = vmatmul.mubr.msk.f32.vlgmr.msra.gmra.mrb[6].mxu1 %vm427_vm5, %v4594_v19  ;;  %3752 = vmatprep.subr.mxu1 %v4163_v0 }
 0x141   : > { %v4005_v47 = vpop.eup %4004  ;;  %v3587_v48 = vmul.f32 -1.442695, %v2164_v45  ;;  %3754 = vmatprep.mubr.msk.f32.mxu1 %vm4164_vm0, %v4163_v0 }
 0x142   : > { %v4007_v50 = vpop.eup %4006  ;;  %v1672_v51 = vadd.f32 1.0, %v4005_v47  ;;  %v2329_v52 = vpop.f32.mrb[22].mxu0 }
 0x143   : > { %4016 = vpow2.f32 %v3587_v48  ;;  %v2330_v9 = vadd.f32 %v2329_v52, %v4582_v44  ;;  %3753 = vmatpush3.msk.msra.mxu1 %vm431_vm4, %v4007_v50  ;;  %v3821_v53 = vpop.f32.mrb[23].mxu0 }
 0x144   : > { %4018 = vrcp.f32 %v1672_v51  ;;  %3755 = vmatmul.mubr.msk.f32.vlgmr.msra.gmra.mrb[8].mxu1 %vm427_vm5, %v4594_v19  ;;  %3762 = vmatprep.subr.mxu1 %v4163_v0 }
 0x145   : > { %v4009_v54 = vpop.eup %4008  ;;  %v3592_v55 = vmul.f32 -1.442695, %v2330_v9  ;;  %3764 = vmatprep.mubr.msk.f32.mxu1 %vm4164_vm0, %v4163_v0 }
 0x146   : > { %v4011_v56 = vpop.eup %4010  ;;  %v1838_v57 = vadd.f32 1.0, %v4009_v54  ;;  %v2495_v58 = vpop.f32.mrb[24].mxu0 }
 0x147   : > { %4020 = vpow2.f32 %v3592_v55  ;;  %v2496_v59 = vadd.f32 %v2495_v58, %v4582_v44  ;;  %3763 = vmatpush3.msk.msra.mxu1 %vm431_vm4, %v4011_v56  ;;  %v3831_v60 = vpop.f32.mrb[25].mxu0 }
 0x148   : > { %4022 = vrcp.f32 %v1838_v57  ;;  %3765 = vmatmul.mubr.msk.f32.vlgmr.msra.gmra.mrb[10].mxu1 %vm427_vm5, %v4594_v19  ;;  %3772 = vmatprep.subr.mxu1 %v4163_v0 }
 0x149   : > { %v4013_v61 = vpop.eup %4012  ;;  %v3597_v62 = vmul.f32 -1.442695, %v2496_v59  ;;  %3774 = vmatprep.mubr.msk.f32.mxu1 %vm4164_vm0, %v4163_v0 }
 0x14a   : > { %v4015_v63 = vpop.eup %4014  ;;  %v2004_v2 = vadd.f32 1.0, %v4013_v61  ;;  %v2661_v3 = vpop.f32.mrb[26].mxu0 }
 0x14b   : > { %4024 = vpow2.f32 %v3597_v62  ;;  %v2662_v4 = vadd.f32 %v2661_v3, %v4582_v44  ;;  %3773 = vmatpush3.msk.msra.mxu1 %vm431_vm4, %v4015_v63  ;;  %v3841_v5 = vpop.f32.mrb[27].mxu0 }
 0x14c   : > { %4026 = vrcp.f32 %v2004_v2  ;;  %3775 = vmatmul.mubr.msk.f32.vlgmr.msra.gmra.mrb[12].mxu1 %vm427_vm5, %v4594_v19  ;;  %3782 = vmatprep.subr.mxu1 %v4163_v0 }
 0x14d   : > { %v4017_v6 = vpop.eup %4016  ;;  %v3602_v7 = vmul.f32 -1.442695, %v2662_v4  ;;  %3784 = vmatprep.mubr.msk.f32.mxu1 %vm4164_vm0, %v4163_v0 }
 0x14e   : > { %v4019_v8 = vpop.eup %4018  ;;  %v2170_v10 = vadd.f32 1.0, %v4017_v6  ;;  %v2827_v11 = vpop.f32.mrb[28].mxu0 }
 0x14f   : > { %4028 = vpow2.f32 %v3602_v7  ;;  %v2828_v12 = vadd.f32 %v2827_v11, %v4582_v44  ;;  %3783 = vmatpush3.msk.msra.mxu1 %vm431_vm4, %v4019_v8  ;;  %v3851_v13 = vpop.f32.mrb[29].mxu0 }
 0x150   : > { %4030 = vrcp.f32 %v2170_v10  ;;  %3785 = vmatmul.mubr.msk.f32.vlgmr.msra.gmra.mrb[14].mxu1 %vm427_vm5, %v4594_v19  ;;  %3792 = vmatprep.subr.mxu1 %v4163_v0 }
 0x151   : > { %v4021_v14 = vpop.eup %4020  ;;  %v3607_v15 = vmul.f32 -1.442695, %v2828_v12  ;;  %3794 = vmatprep.mubr.msk.f32.mxu1 %vm4164_vm0, %v4163_v0 }
 0x152   : > { %v4023_v16 = vpop.eup %4022  ;;  %v2336_v17 = vadd.f32 1.0, %v4021_v14  ;;  %v2993_v18 = vpop.f32.mrb[30].mxu0 }
 0x153   : > { %4032 = vpow2.f32 %v3607_v15  ;;  %v2994_v20 = vadd.f32 %v2993_v18, %v4582_v44  ;;  %3793 = vmatpush3.msk.msra.mxu1 %vm431_vm4, %v4023_v16  ;;  %v3861_v21 = vpop.f32.mrb[31].mxu0 }
 0x154   : > { %4034 = vrcp.f32 %v2336_v17  ;;  %3795 = vmatmul.mubr.msk.f32.vlgmr.msra.gmra.mrb[16].mxu1 %vm427_vm5, %v4594_v19  ;;  %3802 = vmatprep.subr.mxu1 %v4163_v0 }
 0x155   : > { %v4025_v22 = vpop.eup %4024  ;;  %v3612_v23 = vmul.f32 -1.442695, %v2994_v20  ;;  %3804 = vmatprep.mubr.msk.f32.mxu1 %vm4164_vm0, %v4163_v0 }
 0x156   : > { %v4027_v24 = vpop.eup %4026  ;;  %v2502_v25 = vadd.f32 1.0, %v4025_v22 }
 0x157   : > { %4036 = vpow2.f32 %v3612_v23  ;;  %3803 = vmatpush3.msk.msra.mxu1 %vm431_vm4, %v4027_v24 }
 0x158   : > { %4038 = vrcp.f32 %v2502_v25  ;;  %3805 = vmatmul.mubr.msk.f32.vlgmr.msra.gmra.mrb[18].mxu1 %vm427_vm5, %v4594_v19  ;;  %3812 = vmatprep.subr.mxu1 %v4163_v0 }
 0x159   : > { %v4029_v44 = vpop.eup %4028  ;;  %3814 = vmatprep.mubr.msk.f32.mxu1 %vm4164_vm0, %v4163_v0 }
 0x15a   : > { %v4031_v26 = vpop.eup %4030  ;;  %v2668_v27 = vadd.f32 1.0, %v4029_v44  ;;  %v3084_v44 = vld [vmem:[%s4799_s4] sm:$0xff] }
 0x15b   : > { %3813 = vmatpush3.msk.msra.mxu1 %vm431_vm4, %v4031_v26 }
 0x15c   : > { %4040 = vrcp.f32 %v2668_v27  ;;  %3815 = vmatmul.mubr.msk.f32.vlgmr.msra.gmra.mrb[20].mxu1 %vm427_vm5, %v4594_v19  ;;  %3822 = vmatprep.subr.mxu1 %v4163_v0  ;;  %v4167_v27 = vmov 0.0|0.0  }
 0x15d   : > { %v4033_v28 = vpop.eup %4032  ;;  %3824 = vmatprep.mubr.msk.f32.mxu1 %vm4164_vm0, %v4163_v0 }
 0x15e   : > { %v4035_v29 = vpop.eup %4034  ;;  %v2834_v30 = vadd.f32 1.0, %v4033_v28  ;;  %v3088_v28 = vpop.permute.xlu0 %3087 }
 0x15f   : > { %3823 = vmatpush3.msk.msra.mxu1 %vm431_vm4, %v4035_v29 }
 0x160   : > { %4042 = vrcp.f32 %v2834_v30  ;;  %3825 = vmatmul.mubr.msk.f32.vlgmr.msra.gmra.mrb[22].mxu1 %vm427_vm5, %v4594_v19  ;;  %3832 = vmatprep.subr.mxu1 %v4163_v0  ;;  %v4168_v30 = vmov 1  }
 0x161   : > { %v4037_v31 = vpop.eup %4036  ;;  %3834 = vmatprep.mubr.msk.f32.mxu1 %vm4164_vm0, %v4163_v0  ;;  %3978 = vset.pattern.permute.xlu0 %v4168_v30 }
 0x162   : > { %v4039_v32 = vpop.eup %4038  ;;  %v3000_v33 = vadd.f32 1.0, %v4037_v31  ;;  %3180 = vperm.xlu0 %3978, %v4488_v49  }
 0x163   : > { %3833 = vmatpush3.msk.msra.mxu1 %vm431_vm4, %v4039_v32 }
 0x164   : > { %4044 = vrcp.f32 %v3000_v33  ;;  %3835 = vmatmul.mubr.msk.f32.vlgmr.msra.gmra.mrb[24].mxu1 %vm427_vm5, %v4594_v19  ;;  %3842 = vmatprep.subr.mxu1 %v4163_v0 }
 0x165   : > { %3844 = vmatprep.mubr.msk.f32.mxu1 %vm4164_vm0, %v4163_v0 }
 0x166   : > { %v4041_v34 = vpop.eup %4040 }
 0x167   : > { %3843 = vmatpush3.msk.msra.mxu1 %vm431_vm4, %v4041_v34 }
 0x168   : > { %3845 = vmatmul.mubr.msk.f32.vlgmr.msra.gmra.mrb[26].mxu1 %vm427_vm5, %v4594_v19  ;;  %3852 = vmatprep.subr.mxu1 %v4163_v0 }
 0x169   : > { %3854 = vmatprep.mubr.msk.f32.mxu1 %vm4164_vm0, %v4163_v0 }
 0x16a   : > { %v4043_v35 = vpop.eup %4042 }
 0x16b   : > { %3853 = vmatpush3.msk.msra.mxu1 %vm431_vm4, %v4043_v35 }
 0x16c   : > { %3855 = vmatmul.mubr.msk.f32.vlgmr.msra.gmra.mrb[28].mxu1 %vm427_vm5, %v4594_v19  ;;  %3862 = vmatprep.subr.mxu1 %v4163_v0 }
 0x16d   : > { %3864 = vmatprep.mubr.msk.f32.mxu1 %vm4164_vm0, %v4163_v0 }
 0x16e   : > { %v4045_v36 = vpop.eup %4044 }
 0x16f   : > { %3863 = vmatpush3.msk.msra.mxu1 %vm431_vm4, %v4045_v36 }
 0x170   : > { %3865 = vmatmul.mubr.msk.f32.vlgmr.msra.gmra.mrb[30].mxu1 %vm427_vm5, %v4594_v19  ;;  %3895 = vmatprep.subr.bf16.mxu1 %v4167_v27 }
 0x171   : > { %3878 = vmatprep.mubr.msk.f32.mxu1 %vm4164_vm0, %v4163_v0 }
 0x207   : > { %v582_v38 = vpop.f32.mrb[0].mxu1 }
 0x208   : > { %v3716_v39 = vpop.f32.mrb[1].mxu1  ;;  %v586_v40 = vmax.f32 %v409_v37, %v582_v38  ;;  %v3167_v37 = vld [vmem:[%s4800_s5] sm:$0xff] }
 0x209   : > { %v3181_v39 = vpop.permute.xlu0 %3180 }
 0x20b   : > { %v748_v41 = vpop.f32.mrb[2].mxu1 }
 0x20c   : > { %v752_v42 = vmax.f32 %v586_v40, %v748_v41  ;;  %v3726_v43 = vpop.f32.mrb[3].mxu1  ;;  %v4172_v41 = vmov 2  }
 0x20d   : > { %3979 = vset.pattern.permute.xlu0 %v4172_v41 }
 0x20e   : > { %3269 = vperm.xlu0 %3979, %v4488_v49  }
 0x20f   : > { %v914_v45 = vpop.f32.mrb[4].mxu1 }
 0x210   : > { %v918_v46 = vmax.f32 %v752_v42, %v914_v45  ;;  %v3736_v47 = vpop.f32.mrb[5].mxu1 }
 0x212   : > { %3981 = vset.pattern.permute.xlu0 %v4165_v1  ;;  %v3348_v1 = vld [vmem:[%s4804_s9] sm:$0xf] }
 0x213   : > { %v1080_v48 = vpop.f32.mrb[6].mxu1 }
 0x214   : > { %v1084_v50 = vmax.f32 %v918_v46, %v1080_v48  ;;  %v3746_v51 = vpop.f32.mrb[7].mxu1  ;;  %v3258_v48 = vld [vmem:[%s4801_s6] sm:$0xff] }
 0x217   : > { %v1246_v52 = vpop.f32.mrb[8].mxu1 }
 0x218   : > { %v1250_v9 = vmax.f32 %v1084_v50, %v1246_v52  ;;  %v3756_v53 = vpop.f32.mrb[9].mxu1 }
 0x21b   : > { %v1412_v19 = vpop.f32.mrb[10].mxu1 }
 0x21c   : > { %v1416_v54 = vmax.f32 %v1250_v9, %v1412_v19  ;;  %v3766_v55 = vpop.f32.mrb[11].mxu1  ;;  %v3347_v19 = vld [vmem:[%s4802_s7] sm:$0xf] }
 0x21f   : > { %v1578_v56 = vpop.f32.mrb[12].mxu1 }
 0x220   : > { %v1582_v57 = vmax.f32 %v1416_v54, %v1578_v56  ;;  %v3776_v58 = vpop.f32.mrb[13].mxu1 }
 0x223   : > { %v1744_v59 = vpop.f32.mrb[14].mxu1 }
 0x224   : > { %v1748_v60 = vmax.f32 %v1582_v57, %v1744_v59  ;;  %v3786_v61 = vpop.f32.mrb[15].mxu1 }
 0x227   : > { %v1910_v62 = vpop.f32.mrb[16].mxu1 }
 0x228   : > { %v1914_v63 = vmax.f32 %v1748_v60, %v1910_v62  ;;  %v3796_v2 = vpop.f32.mrb[17].mxu1 }
 0x22b   : > { %v2076_v3 = vpop.f32.mrb[18].mxu1 }
 0x22c   : > { %v2080_v4 = vmax.f32 %v1914_v63, %v2076_v3  ;;  %v3806_v5 = vpop.f32.mrb[19].mxu1 }
 0x22f   : > { %v2242_v6 = vpop.f32.mrb[20].mxu1 }
 0x230   : > { %v2246_v7 = vmax.f32 %v2080_v4, %v2242_v6  ;;  %v3816_v8 = vpop.f32.mrb[21].mxu1 }
 0x233   : > { %v2408_v10 = vpop.f32.mrb[22].mxu1 }
 0x234   : > { %v2412_v11 = vmax.f32 %v2246_v7, %v2408_v10  ;;  %v3826_v12 = vpop.f32.mrb[23].mxu1 }
 0x237   : > { %v2574_v13 = vpop.f32.mrb[24].mxu1 }
 0x238   : > { %v2578_v14 = vmax.f32 %v2412_v11, %v2574_v13  ;;  %v3836_v15 = vpop.f32.mrb[25].mxu1 }
 0x23b   : > { %v2740_v16 = vpop.f32.mrb[26].mxu1 }
 0x23c   : > { %v2744_v17 = vmax.f32 %v2578_v14, %v2740_v16  ;;  %v3846_v18 = vpop.f32.mrb[27].mxu1 }
 0x23f   : > { %v2906_v20 = vpop.f32.mrb[28].mxu1 }
 0x240   : > { %v2910_v21 = vmax.f32 %v2744_v17, %v2906_v20  ;;  %v3856_v22 = vpop.f32.mrb[29].mxu1 }
 0x243   : > { %v3072_v23 = vpop.f32.mrb[30].mxu1 }
 0x244   : > { %v3076_v24 = vmax.f32 %v2910_v21, %v3072_v23  ;;  %v3866_v25 = vpop.f32.mrb[31].mxu1 }
 0x246   : > { %3078 = vst.msk [vmem:[#allocation2] sm:$0xf] %vm399_vm6, %v3076_v24 }
 0x24d   : > { %v3083_v26 = vld [vmem:[#allocation2] sm:$0xf] }
 0x24e   : > { %3868 = vmatpush3.msk.msra.mxu0 %vm431_vm4, %v3083_v26 }
 0x24f   : > { %3870 = vmatmul.mubr.msk.f32.vlgmr.msra.gmra.mrb[32].mxu0 %vm427_vm5, %v3084_v44  ;;  %3899 = vmatprep.subr.bf16.mxu0 %v4167_v27 }
 0x250   : > { %3887 = vmatprep.mubr.msk.f32.mxu0 %vm4164_vm0, %v4163_v0 }
 0x28d   : > { %v3270_v49 = vpop.permute.xlu0 %3269 }
 0x322   : > { %v3162_v29 = vpop.f32.mrb[32].mxu0 }
 0x323   : > { %v3163_v31 = vadd.f32 %v3162_v29, %v3088_v28  ;;  %v3871_v32 = vpop.f32.mrb[33].mxu0 }
 0x325   : > { %v3166_v33 = vmax.f32 %v3163_v31, 0.0 }
 0x327   : > { %3169 = vrot.lane.b32.xlu1 %v3166_v33, %s4169_s12 }
 0x32b   : > { %3174 = vrot.lane.b32.xlu1 %v3166_v33, %s4170_s17 }
 0x399   : > { %v3170_v34 = vpop.permute.xlu1 %3169 }
 0x39a   : > { %v3896_v36 = vpack.c.bf16 %v3166_v33, %v3170_v34 }
 0x39c   : > { %3898 = vmatpush3.bf16.msk.msra.mxu1 %vm4709_vm10, %v3896_v36 }
 0x39d   : > { %3876 = vmatprep.subr.mxu1 %v4163_v0  ;;  %v3175_v38 = vpop.permute.xlu1 %3174 }
 0x3a0   : > { %3877 = vmatpush3.msk.msra.mxu1 %vm3177_vm11, %v3175_v38 }
 0x3a1   : > { %3879 = vmatmul.mubr.msk.f32.vlgmr.msra.gmra.mrb[32].mxu1 %vm3183_vm12, %v3167_v37  ;;  %3890 = vmatprep.subr.mxu1 %v4163_v0 }
 0x3a2   : > { %3892 = vmatprep.mubr.msk.f32.mxu1 %vm4164_vm0, %v4163_v0 }
 0x474   : > { %v3253_v40 = vpop.f32.mrb[32].mxu1 }
 0x475   : > { %v3254_v42 = vadd.f32 %v3253_v40, %v3181_v39  ;;  %v3880_v43 = vpop.f32.mrb[33].mxu1 }
 0x477   : > { %v3257_v45 = vmax.f32 %v3254_v42, 0.0 }
 0x479   : > { %3260 = vrot.lane.b32.xlu1 %v3257_v45, %s4169_s12  ;;  %s3627_s12 = sshll.u32 %s4150_s16, 6  ;;  %s4173_s16 = smov [#allocation6]  }
 0x47a   : > { %s4745_s22 = scalar_lea.hbm %s4805_s10, %s3627_s12  ;;  %s4080_s23 = sshll.u32 %s4173_s16, 4  ;;  %s4081_s23 = int_to_ptr.vmem [resolvable:$false] %s4080_s23 }
 0x47b   : > { %s4082_s29 = scalar_lea.vmem %s4081_s23, 128 }
 0x47d   : > { %3264 = vrot.lane.b32.xlu1 %v3257_v45, %s4170_s17  ;;  %s393_s17 = scalar_lea.vmem [#allocation6], %s3534_s30 }
 0x47e   : > { %s3444_s21 = sshll.u32 %s393_s17, 4  ;;  %s4747_s21 = int_to_ptr.vmem [resolvable:$true] %s3444_s21 }
 0x47f   : > { %s4076_s11 = scalar_lea.vmem %s4747_s21, 64  ;;  %p4083_p6 = scmp.lt.s32.totalorder %s4747_s21, %s4081_s23 }
 0x480   : > { %p4077_p8 = scmp.ne.s32.totalorder %s4747_s21, %s4076_s11  ;;  %p4084_p13 = scmp.lt.s32.totalorder %s4082_s29, %s4076_s11 }
 0x481   : > { %3351 = vperm.xlu1 %3980, %v3348_v1  }
 0x482   : > { %p4078_p11 = pnand %p4077_p8, %p4819_p9  ;;  %p4085_p2 = por %p4084_p13, %p4083_p6 }
 0x484   : > { %p4079_p0 = pneg %p4078_p11 }
 0x486   : > { %p4086_p5 = pnand %p4085_p2, %p4079_p0 }
 0x4eb   : > { %v3261_v46 = vpop.permute.xlu1 %3260 }
 0x4ec   : > { %v3900_v47 = vpack.c.bf16 %v3257_v45, %v3261_v46 }
 0x4ee   : > { %3902 = vmatpush3.bf16.msk.msra.mxu0 %vm4709_vm10, %v3900_v47 }
 0x4ef   : > { %3885 = vmatprep.subr.mxu0 %v4163_v0  ;;  %v3265_v50 = vpop.permute.xlu1 %3264 }
 0x4f2   : > { %3886 = vmatpush3.msk.msra.mxu0 %vm3177_vm11, %v3265_v50 }
 0x4f3   : > { %3888 = vmatmul.mubr.msk.f32.vlgmr.msra.gmra.mrb[34].mxu0 %vm3183_vm12, %v3258_v48 }
 0x500   : > { %v3352_v54 = vpop.permute.xlu1 %3351 }
 0x5c6   : > { %v3341_v51 = vpop.f32.mrb[34].mxu0 }
 0x5c7   : > { %v3342_v52 = vadd.f32 %v3341_v51, %v3270_v49  ;;  %v3889_v0 = vpop.f32.mrb[35].mxu0 }
 0x5c9   : > { %v3345_v9 = vmax.f32 %v3342_v52, 0.0 }
 0x5cb   : > { %v3346_v53 = vadd.f32 %v3345_v9, %v3166_v33 }
 0x5cd   : > { %3891 = vmatpush3.msra.mxu1 %v3346_v53 }
 0x5ce   : > { %3893 = vmatmul.mubr.msk.f32.vlgmr.msra.gmra.mrb[34].mxu1 %vm3354_vm13, %v3347_v19 }
 0x6a1   : > { %v3424_v55 = vpop.f32.mrb[34].mxu1 }
 0x6a2   : > { %v3425_v56 = vadd.f32 %v3424_v55, %v3352_v54  ;;  %v3894_v57 = vpop.f32.mrb[35].mxu1 }
 0x6a4   : > { %v3428_v58 = vmax.f32 %v3425_v56, 0.0 }
 0x6a6   : > { %3429 = vst.msk [vmem:[%s393_s17] sm:$0xf] %vm399_vm6, %v3428_v58 }
 0x6a7   : > { %4089 = shalt.err (!%p4086_p5)
}
 0x6a8   : > { %s4090_s20 = scalar_lea.hbm %s4745_s22, 64  ;;  %s4094_s17 = scalar_lea.hbm %s4805_s10, 128 }
 0x6a9   : > { %p4091_p4 = scmp.ne.s32.totalorder %s4745_s22, %s4090_s20  ;;  %p4095_p12 = scmp.lt.u32.totalorder %s4745_s22, %s4805_s10 }
 0x6aa   : > { %p4096_p1 = scmp.lt.u32.totalorder %s4094_s17, %s4090_s20  ;;  %p4098_p8 = scmp.lt.u32.totalorder %s4090_s20, %s4745_s22 }
 0x6ab   : > { %p4092_p7 = pnand %p4091_p4, %p4819_p9 }
 0x6ac   : > { %p4097_p3 = por %p4096_p1, %p4095_p12 }
 0x6ad   : > { %p4093_p10 = pneg %p4092_p7 }
 0x6ae   : > { %p4099_p11 = por %p4098_p8, %p4097_p3 }
 0x6b0   : > { %p4100_p0 = pnand %p4099_p11, %p4093_p10 }
 0x6b2   : > { %4103 = shalt.err (!%p4100_p0)
}
 0x6b3   : > { %3905 = dma.vmem_to_hbm [thread:$0]  (%p4819_p9), %s4747_s21, 64, %s4745_s22, %s3431_s19  }
 0x6b4 PF: > { %s3456_s11 = sand.u32 1, %s4138_s13   ;;  %p4820_p6 = scmp.ne.s32.totalorder %s4814_s28, 0 }
 0x6b5   : > { %p4821_p13 = scmp.ge.s32.totalorder %s4158_s18, 2  ;;  %s3457_s16 = scalar_lea.sflag [#allocation5], %s3456_s11 }
 0x6b7   : > { %p3912_p2 = pnand %p4821_p13, %p4820_p6 }
 0x6b9   : > { %4133 = dma.done.wait (!%p3912_p2), %s3457_s16, 64  }
 0x6ba   : > { %4135 = vsyncadd (!%p3912_p2), %s3457_s16, 4294967232  ;;  %s26_s18 = sadd.s32 1, %s4158_s18   ;;  %s4822_s16 = sld [smem:[#allocation9_spill]] }
 0x6bb   : > { %p23_p5 = scmp.ge.s32.totalorder %s26_s18, 4   ;;  %s4823_s17 = sld [smem:[#allocation10_spill]] }
 0x6bc   : > { %s4824_s13 = smov %s4142_s14  ;;  %s4825_s14 = smov %s4146_s15 }
 0x6bd   : > { %s4826_s15 = smov %s4285_s27  ;;  %25 = sbr.rel (!%p23_p5) target bundleno = 6 (0x6), region = 113 }
 0x6c4   :  { %3462 = vsyncpa [#allocation4], 1 }
 0x6c5   :  { %3464 = vsyncpa [#allocation4 + $0x1], 1 }
 0x6c6   :  { %3465 = vsyncpa [#allocation5], 1 }
 0x6c7   :  { %3467 = vsyncpa [#allocation5 + $0x1], 1 }

</bundles_post_ra>
